<compile_context>
chip_gen: v6e
topology: v6e:2x2x1
jax: 0.10.0
libtpu: 0.0.40
codegen_flags: <defaults>
</compile_context>

<pallas_src>
import functools

import jax
import jax.numpy as jnp
from jax.experimental import pallas as pl
from jax.experimental.pallas import tpu as pltpu


def _layernorm(x, g, b, eps=1e-5):
    mu = jnp.mean(x, axis=-1, keepdims=True)
    var = jnp.mean((x - mu) ** 2, axis=-1, keepdims=True)
    return (x - mu) * jax.lax.rsqrt(var + eps) * g + b


def _level_kernel(x_ref,
                  ln1g_ref, ln1b_ref,
                  wqkv_ref, bqkv_ref, wo_ref, bo_ref,
                  ln2g_ref, ln2b_ref,
                  w1_ref, b1_ref, w2_ref, b2_ref,
                  o_ref, state_ref,
                  *, num_heads, head_dim, kernel_size, is_global):
    d = pl.program_id(1)
    depth = pl.num_programs(1)

    Bt, L, D = state_ref.shape
    H, dh = num_heads, head_dim
    M = Bt * L
    cdt = wqkv_ref.dtype            # compute dtype for MXU operands (bf16)

    # Load the input once (first block); the residual stream then lives in VMEM
    # scratch across all `depth` grid steps.
    @pl.when(d == 0)
    def _():
        state_ref[...] = x_ref[...].astype(jnp.float32)

    x = state_ref[...].reshape(M, D)                       # (Bt*L, D) f32

    # ---------------- attention sub-block ----------------
    h = _layernorm(x, ln1g_ref[0], ln1b_ref[0])
    qkv = jnp.dot(h.astype(cdt), wqkv_ref[0],
                  preferred_element_type=jnp.float32) + bqkv_ref[0]   # (M, 3D) f32
    scale = 1.0 / (dh ** 0.5)
    q = qkv[:, 0 * D:1 * D] * scale
    k = qkv[:, 1 * D:2 * D]
    v = qkv[:, 2 * D:3 * D]

    if not is_global:
        qi = jax.lax.broadcasted_iota(jnp.int32, (L, L), 0)
        ki = jax.lax.broadcasted_iota(jnp.int32, (L, L), 1)
        neighbor = (jnp.abs(qi - ki) <= (kernel_size // 2))[None]     # (1, L, L)

    wo = wo_ref[0]                                         # (D, D) bf16
    attn = jnp.zeros((M, D), jnp.float32)
    for hh in range(H):                                    # static, small head count
        s = hh * dh
        qh = q[:, s:s + dh].reshape(Bt, L, dh).astype(cdt)
        kh = k[:, s:s + dh].reshape(Bt, L, dh).astype(cdt)
        vh = v[:, s:s + dh].reshape(Bt, L, dh).astype(cdt)
        # batched over the batch tile; keeps attention within each sequence.
        scores = jnp.einsum('bqd,bkd->bqk', qh, kh,
                            preferred_element_type=jnp.float32)       # (Bt, L, L) f32
        if not is_global:
            scores = jnp.where(neighbor, scores, -1e30)    # mask applied in f32
        scores = scores - jnp.max(scores, axis=-1, keepdims=True)
        p = jnp.exp(scores)
        p = p * pl.reciprocal(jnp.sum(p, axis=-1, keepdims=True), approx=True)
        ctx = jnp.einsum('bqk,bkd->bqd', p.astype(cdt), vh,
                         preferred_element_type=jnp.float32)          # (Bt, L, dh)
        # fold the head concat into the output projection.
        attn = attn + jnp.dot(ctx.reshape(M, dh).astype(cdt), wo[s:s + dh, :],
                              preferred_element_type=jnp.float32)
    x = x + attn + bo_ref[0]                               # dropout == identity (eval)

    # ---------------- MLP sub-block ----------------
    h2 = _layernorm(x, ln2g_ref[0], ln2b_ref[0])
    m1 = jnp.dot(h2.astype(cdt), w1_ref[0],
                 preferred_element_type=jnp.float32) + b1_ref[0]
    m1 = jax.nn.gelu(m1, approximate=True)                 # TODO(synk): erf GELU (see header)
    m2 = jnp.dot(m1.astype(cdt), w2_ref[0],
                 preferred_element_type=jnp.float32) + b2_ref[0]
    x = x + m2

    state_ref[...] = x.reshape(Bt, L, D)

    @pl.when(d == depth - 1)
    def _():
        o_ref[...] = x.reshape(Bt, L, D).astype(o_ref.dtype)


_PARAM_ORDER = ("ln1_g", "ln1_b",
                "wqkv", "bqkv", "wo", "bo",
                "ln2_g", "ln2_b",
                "w1", "b1", "w2", "b2")


def pack_level_params(block_params, compute_dtype=jnp.bfloat16):
    """Stack per-block params along a leading depth axis; fuse QKV; cast matmul
    weights to bf16 (halves weight DMA / VMEM; f32 accumulation in-kernel)."""
    def stack(name):
        return jnp.stack([blk[name] for blk in block_params], axis=0)

    return {
        "ln1_g": stack("ln1_g"), "ln1_b": stack("ln1_b"),
        "wqkv": jnp.stack([jnp.concatenate([b["wq"], b["wk"], b["wv"]], axis=1)
                           for b in block_params], axis=0).astype(compute_dtype),
        "bqkv": jnp.stack([jnp.concatenate([b["bq"], b["bk"], b["bv"]], axis=1)
                           for b in block_params], axis=0),
        "wo": stack("wo").astype(compute_dtype), "bo": stack("bo"),
        "ln2_g": stack("ln2_g"), "ln2_b": stack("ln2_b"),
        "w1": stack("w1").astype(compute_dtype), "b1": stack("b1"),
        "w2": stack("w2").astype(compute_dtype), "b2": stack("b2"),
    }


def hourglass_decoder_level(x, packed, *, head_dim, kernel_size, is_global,
                            batch_tile=None):
    """Forward of HourglassDecoderLevel: all `depth` blocks fused in one pallas_call."""
    B, L, D = x.shape
    depth = packed["wqkv"].shape[0]
    num_heads = D // head_dim
    assert num_heads * head_dim == D

    bt = B if batch_tile is None else batch_tile
    assert B % bt == 0
    grid = (B // bt, depth)          # batch tiles "parallel" (megacore), depth "arbitrary"

    kernel = functools.partial(_level_kernel,
                               num_heads=num_heads,
                               head_dim=head_dim,
                               kernel_size=kernel_size,
                               is_global=is_global)

    def weight_spec(arr):
        # one block's weights per depth step; index_map depends on d so the
        # pipeline prefetches block d+1's weights while block d computes.
        return pl.BlockSpec((1,) + arr.shape[1:], lambda b, d: (d, 0, 0))

    in_specs = [pl.BlockSpec((bt, L, D), lambda b, d: (b, 0, 0))]
    in_specs += [weight_spec(packed[name]) for name in _PARAM_ORDER]
    out_spec = pl.BlockSpec((bt, L, D), lambda b, d: (b, 0, 0))

    return pl.pallas_call(
        kernel,
        out_shape=jax.ShapeDtypeStruct((B, L, D), x.dtype),
        grid_spec=pltpu.PrefetchScalarGridSpec(
            num_scalar_prefetch=0,
            grid=grid,
            in_specs=in_specs,
            out_specs=out_spec,
            scratch_shapes=[pltpu.VMEM((bt, L, D), jnp.float32)]),
        compiler_params=pltpu.CompilerParams(
            dimension_semantics=("parallel", "arbitrary")),
    )(x, *[packed[name] for name in _PARAM_ORDER])


def init_level_params(key, dim, depth):
    """Deterministic synthetic parameters mirroring the module's __init__ shapes."""
    hidden = 4 * dim
    params = []
    for d in range(depth):
        ks = jax.random.split(jax.random.fold_in(key, d), 6)

        def lin(k, fan_in, shape):
            return (jax.random.normal(k, shape, jnp.float32)
                    * (1.0 / jnp.sqrt(jnp.float32(fan_in))))

        blk = dict(
            ln1_g=jnp.ones((1, dim), jnp.float32),
            ln1_b=jnp.zeros((1, dim), jnp.float32),
            wq=lin(ks[0], dim, (dim, dim)), bq=jnp.zeros((1, dim), jnp.float32),
            wk=lin(ks[1], dim, (dim, dim)), bk=jnp.zeros((1, dim), jnp.float32),
            wv=lin(ks[2], dim, (dim, dim)), bv=jnp.zeros((1, dim), jnp.float32),
            wo=lin(ks[3], dim, (dim, dim)), bo=jnp.zeros((1, dim), jnp.float32),
            ln2_g=jnp.ones((1, dim), jnp.float32),
            ln2_b=jnp.zeros((1, dim), jnp.float32),
            w1=lin(ks[4], dim, (dim, hidden)), b1=jnp.zeros((1, hidden), jnp.float32),
            w2=lin(ks[5], hidden, (hidden, dim)), b2=jnp.zeros((1, dim), jnp.float32),
        )
        params.append(blk)
    return params


if __name__ == "__main__":
    # Small shapes consistent with the module: dim=32, head_dim=8, kernel_size=3, depth=2.
    B, L, D = 2, 8, 32
    HEAD_DIM, KERNEL_SIZE, DEPTH = 8, 3, 2

    key = jax.random.PRNGKey(0)
    kx, kp_local, kp_global = jax.random.split(key, 3)
    x = jax.random.normal(kx, (B, L, D), jnp.float32)

    # Neighborhood-attention level (is_global=False)
    local_packed = pack_level_params(init_level_params(kp_local, D, DEPTH))
    y_local = hourglass_decoder_level(x, local_packed,
                                      head_dim=HEAD_DIM,
                                      kernel_size=KERNEL_SIZE,
                                      is_global=False)

    # Global-attention level (is_global=True)
    global_packed = pack_level_params(init_level_params(kp_global, D, DEPTH))
    y_global = hourglass_decoder_level(x, global_packed,
                                       head_dim=HEAD_DIM,
                                       kernel_size=KERNEL_SIZE,
                                       is_global=True)

    jax.block_until_ready((y_local, y_global))
    assert y_local.shape == (B, L, D) and y_global.shape == (B, L, D)
    assert bool(jnp.all(jnp.isfinite(y_local))) and bool(jnp.all(jnp.isfinite(y_global)))
    print("KERNEL_OK")
</pallas_src>

<mosaic_0001>
module attributes {stable_mosaic.version = 11 : i64} {
  func.func @_level_kernel(%arg0: i32, %arg1: i32, %arg2: memref<2x8x32xf32, #tpu.memory_space<vmem>>, %arg3: memref<1x1x32xf32, #tpu.memory_space<vmem>>, %arg4: memref<1x1x32xf32, #tpu.memory_space<vmem>>, %arg5: memref<1x32x96xbf16, #tpu.memory_space<vmem>>, %arg6: memref<1x1x96xf32, #tpu.memory_space<vmem>>, %arg7: memref<1x32x32xbf16, #tpu.memory_space<vmem>>, %arg8: memref<1x1x32xf32, #tpu.memory_space<vmem>>, %arg9: memref<1x1x32xf32, #tpu.memory_space<vmem>>, %arg10: memref<1x1x32xf32, #tpu.memory_space<vmem>>, %arg11: memref<1x32x128xbf16, #tpu.memory_space<vmem>>, %arg12: memref<1x1x128xf32, #tpu.memory_space<vmem>>, %arg13: memref<1x128x32xbf16, #tpu.memory_space<vmem>>, %arg14: memref<1x1x32xf32, #tpu.memory_space<vmem>>, %arg15: memref<2x8x32xf32, #tpu.memory_space<vmem>>, %arg16: memref<2x8x32xf32, #tpu.memory_space<vmem>>) attributes {dimension_semantics = [#tpu.dimension_semantics<parallel>, #tpu.dimension_semantics<arbitrary>], iteration_bounds = array<i64: 1, 2>, scalar_prefetch = 0 : i64, scratch_operands = 1 : i64, tpu.core_type = #tpu.core_type<tc>, window_params = [{transform_indices = @transform_0, window_bounds = array<i64: 2, 8, 32>}, {transform_indices = @transform_1, window_bounds = array<i64: 1, 1, 32>}, {transform_indices = @transform_2, window_bounds = array<i64: 1, 1, 32>}, {transform_indices = @transform_3, window_bounds = array<i64: 1, 32, 96>}, {transform_indices = @transform_4, window_bounds = array<i64: 1, 1, 96>}, {transform_indices = @transform_5, window_bounds = array<i64: 1, 32, 32>}, {transform_indices = @transform_6, window_bounds = array<i64: 1, 1, 32>}, {transform_indices = @transform_7, window_bounds = array<i64: 1, 1, 32>}, {transform_indices = @transform_8, window_bounds = array<i64: 1, 1, 32>}, {transform_indices = @transform_9, window_bounds = array<i64: 1, 32, 128>}, {transform_indices = @transform_10, window_bounds = array<i64: 1, 1, 128>}, {transform_indices = @transform_11, window_bounds = array<i64: 1, 128, 32>}, {transform_indices = @transform_12, window_bounds = array<i64: 1, 1, 32>}, {transform_indices = @transform_13, window_bounds = array<i64: 2, 8, 32>}]} {
    %c0_i32 = arith.constant 0 : i32
    %0 = arith.cmpi eq, %arg1, %c0_i32 : i32
    %1 = arith.extui %0 : i1 to i32
    %c0_i32_0 = arith.constant 0 : i32
    %2 = arith.cmpi ne, %1, %c0_i32_0 : i32
    scf.if %2 {
      %c0_86 = arith.constant 0 : index
      %c0_87 = arith.constant 0 : index
      %c0_88 = arith.constant 0 : index
      %244 = vector.load %arg2[%c0_86, %c0_87, %c0_88] : memref<2x8x32xf32, #tpu.memory_space<vmem>>, vector<2x8x32xf32>
      %c0_89 = arith.constant 0 : index
      %c0_90 = arith.constant 0 : index
      %c0_91 = arith.constant 0 : index
      %245 = vector.load %arg16[%c0_89, %c0_90, %c0_91] : memref<2x8x32xf32, #tpu.memory_space<vmem>>, vector<2x8x32xf32>
      tpu.vector_store %arg16[%c0_89, %c0_90, %c0_91], %244 {strides = array<i32>} : memref<2x8x32xf32, #tpu.memory_space<vmem>>, vector<2x8x32xf32>,
    } else {
    }
    %c0 = arith.constant 0 : index
    %c0_1 = arith.constant 0 : index
    %c0_2 = arith.constant 0 : index
    %3 = vector.load %arg16[%c0, %c0_1, %c0_2] : memref<2x8x32xf32, #tpu.memory_space<vmem>>, vector<2x8x32xf32>
    %4 = vector.shape_cast %3 : vector<2x8x32xf32> to vector<16x32xf32>
    %c0_3 = arith.constant 0 : index
    %c0_4 = arith.constant 0 : index
    %c0_5 = arith.constant 0 : index
    %5 = vector.load %arg3[%c0_3, %c0_4, %c0_5] : memref<1x1x32xf32, #tpu.memory_space<vmem>>, vector<1x1x32xf32>
    %6 = vector.shape_cast %5 : vector<1x1x32xf32> to vector<1x32xf32>
    %c0_6 = arith.constant 0 : index
    %c0_7 = arith.constant 0 : index
    %c0_8 = arith.constant 0 : index
    %7 = vector.load %arg4[%c0_6, %c0_7, %c0_8] : memref<1x1x32xf32, #tpu.memory_space<vmem>>, vector<1x1x32xf32>
    %8 = vector.shape_cast %7 : vector<1x1x32xf32> to vector<1x32xf32>
    %cst = arith.constant dense<0.000000e+00> : vector<16xf32>
    %9 = vector.multi_reduction <add>, %4, %cst [1] : vector<16x32xf32> to vector<16xf32>
    %10 = vector.shape_cast %9 : vector<16xf32> to vector<16x1xf32>
    %cst_9 = arith.constant 3.200000e+01 : f32
    %11 = vector.broadcast %cst_9 : f32 to vector<16x1xf32>
    %12 = arith.divf %10, %11 : vector<16x1xf32>
    %13 = vector.broadcast %12 : vector<16x1xf32> to vector<16x32xf32>
    %14 = arith.subf %4, %13 : vector<16x32xf32>
    %15 = arith.mulf %14, %14 : vector<16x32xf32>
    %cst_10 = arith.constant dense<0.000000e+00> : vector<16xf32>
    %16 = vector.multi_reduction <add>, %15, %cst_10 [1] : vector<16x32xf32> to vector<16xf32>
    %17 = vector.shape_cast %16 : vector<16xf32> to vector<16x1xf32>
    %cst_11 = arith.constant 3.200000e+01 : f32
    %18 = vector.broadcast %cst_11 : f32 to vector<16x1xf32>
    %19 = arith.divf %17, %18 : vector<16x1xf32>
    %20 = vector.broadcast %12 : vector<16x1xf32> to vector<16x32xf32>
    %21 = arith.subf %4, %20 : vector<16x32xf32>
    %cst_12 = arith.constant 9.99999974E-6 : f32
    %22 = vector.broadcast %cst_12 : f32 to vector<16x1xf32>
    %23 = arith.addf %19, %22 : vector<16x1xf32>
    %24 = math.rsqrt %23 : vector<16x1xf32>
    %25 = vector.broadcast %24 : vector<16x1xf32> to vector<16x32xf32>
    %26 = arith.mulf %21, %25 : vector<16x32xf32>
    %27 = vector.broadcast %6 : vector<1x32xf32> to vector<16x32xf32>
    %28 = arith.mulf %26, %27 : vector<16x32xf32>
    %29 = vector.broadcast %8 : vector<1x32xf32> to vector<16x32xf32>
    %30 = arith.addf %28, %29 : vector<16x32xf32>
    %31 = arith.truncf %30 : vector<16x32xf32> to vector<16x32xbf16>
    %c0_13 = arith.constant 0 : index
    %c0_14 = arith.constant 0 : index
    %c0_15 = arith.constant 0 : index
    %32 = vector.load %arg5[%c0_13, %c0_14, %c0_15] : memref<1x32x96xbf16, #tpu.memory_space<vmem>>, vector<1x32x96xbf16>
    %33 = vector.shape_cast %32 : vector<1x32x96xbf16> to vector<32x96xbf16>
    %cst_16 = arith.constant dense<0.000000e+00> : vector<16x96xf32>
    %34 = tpu.matmul %31, %33, %cst_16 {dimension_numbers = #tpu.dot_dimension_numbers<[1], [0], [0], [1], [0, 0, 1, 1], [], []>} : vector<16x32xbf16>, vector<32x96xbf16>, vector<16x96xf32> -> vector<16x96xf32>
    %c0_17 = arith.constant 0 : index
    %c0_18 = arith.constant 0 : index
    %c0_19 = arith.constant 0 : index
    %35 = vector.load %arg6[%c0_17, %c0_18, %c0_19] : memref<1x1x96xf32, #tpu.memory_space<vmem>>, vector<1x1x96xf32>
    %36 = vector.shape_cast %35 : vector<1x1x96xf32> to vector<1x96xf32>
    %37 = vector.broadcast %36 : vector<1x96xf32> to vector<16x96xf32>
    %38 = arith.addf %34, %37 : vector<16x96xf32>
    %39 = vector.extract_strided_slice %38 {offsets = [0, 0], sizes = [16, 32], strides = [1, 1]} : vector<16x96xf32> to vector<16x32xf32>
    %cst_20 = arith.constant 0.353553385 : f32
    %40 = vector.broadcast %cst_20 : f32 to vector<16x32xf32>
    %41 = arith.mulf %39, %40 : vector<16x32xf32>
    %42 = vector.extract_strided_slice %38 {offsets = [0, 32], sizes = [16, 32], strides = [1, 1]} : vector<16x96xf32> to vector<16x32xf32>
    %43 = vector.extract_strided_slice %38 {offsets = [0, 64], sizes = [16, 32], strides = [1, 1]} : vector<16x96xf32> to vector<16x32xf32>
    %44 = tpu.iota {dimensions = array<i32: 0>} : vector<8x8xi32>
    %45 = tpu.iota {dimensions = array<i32: 1>} : vector<8x8xi32>
    %46 = arith.subi %44, %45 : vector<8x8xi32>
    %47 = math.absi %46 : vector<8x8xi32>
    %c1_i32 = arith.constant 1 : i32
    %48 = vector.broadcast %c1_i32 : i32 to vector<8x8xi32>
    %49 = arith.cmpi sle, %47, %48 : vector<8x8xi32>
    %50 = vector.shape_cast %49 : vector<8x8xi1> to vector<1x8x8xi1>
    %c0_21 = arith.constant 0 : index
    %c0_22 = arith.constant 0 : index
    %c0_23 = arith.constant 0 : index
    %51 = vector.load %arg7[%c0_21, %c0_22, %c0_23] : memref<1x32x32xbf16, #tpu.memory_space<vmem>>, vector<1x32x32xbf16>
    %52 = vector.shape_cast %51 : vector<1x32x32xbf16> to vector<32x32xbf16>
    %cst_24 = arith.constant 0.000000e+00 : f32
    %53 = vector.broadcast %cst_24 : f32 to vector<16x32xf32>
    %54 = vector.extract_strided_slice %41 {offsets = [0, 0], sizes = [16, 8], strides = [1, 1]} : vector<16x32xf32> to vector<16x8xf32>
    %55 = vector.shape_cast %54 : vector<16x8xf32> to vector<2x8x8xf32>
    %56 = arith.truncf %55 : vector<2x8x8xf32> to vector<2x8x8xbf16>
    %57 = vector.extract_strided_slice %42 {offsets = [0, 0], sizes = [16, 8], strides = [1, 1]} : vector<16x32xf32> to vector<16x8xf32>
    %58 = vector.shape_cast %57 : vector<16x8xf32> to vector<2x8x8xf32>
    %59 = arith.truncf %58 : vector<2x8x8xf32> to vector<2x8x8xbf16>
    %60 = vector.extract_strided_slice %43 {offsets = [0, 0], sizes = [16, 8], strides = [1, 1]} : vector<16x32xf32> to vector<16x8xf32>
    %61 = vector.shape_cast %60 : vector<16x8xf32> to vector<2x8x8xf32>
    %62 = arith.truncf %61 : vector<2x8x8xf32> to vector<2x8x8xbf16>
    "tpu.trace_start"() <{level = 10 : i32, message = "bqd,bkd->bqk"}> : () -> ()
    %cst_25 = arith.constant dense<0.000000e+00> : vector<2x8x8xf32>
    %63 = tpu.matmul %56, %59, %cst_25 {dimension_numbers = #tpu.dot_dimension_numbers<[2], [2], [1], [1], [0, 0, 0, 1, 1, 1], [0], [0]>} : vector<2x8x8xbf16>, vector<2x8x8xbf16>, vector<2x8x8xf32> -> vector<2x8x8xf32>
    %cst_26 = arith.constant -1.000000e+30 : f32
    "tpu.trace_stop"() : () -> ()
    %64 = vector.shape_cast %50 : vector<1x8x8xi1> to vector<1x8x8xi1>
    %65 = vector.broadcast %64 : vector<1x8x8xi1> to vector<2x8x8xi1>
    %66 = vector.broadcast %cst_26 : f32 to vector<2x8x8xf32>
    %67 = arith.select %65, %63, %66 : vector<2x8x8xi1>, vector<2x8x8xf32>
    %cst_27 = arith.constant dense<0xFF800000> : vector<2x8xf32>
    %68 = vector.multi_reduction <maximumf>, %67, %cst_27 [2] : vector<2x8x8xf32> to vector<2x8xf32>
    %69 = vector.shape_cast %68 : vector<2x8xf32> to vector<2x8x1xf32>
    %70 = vector.broadcast %69 : vector<2x8x1xf32> to vector<2x8x8xf32>
    %71 = arith.subf %67, %70 : vector<2x8x8xf32>
    %72 = math.exp %71 : vector<2x8x8xf32>
    %cst_28 = arith.constant dense<0.000000e+00> : vector<2x8xf32>
    %73 = vector.multi_reduction <add>, %72, %cst_28 [2] : vector<2x8x8xf32> to vector<2x8xf32>
    %74 = vector.shape_cast %73 : vector<2x8xf32> to vector<2x8x1xf32>
    %75 = tpu.reciprocal %74 {approx = true} : vector<2x8x1xf32> -> vector<2x8x1xf32>
    %76 = vector.broadcast %75 : vector<2x8x1xf32> to vector<2x8x8xf32>
    %77 = arith.mulf %72, %76 : vector<2x8x8xf32>
    %78 = arith.truncf %77 : vector<2x8x8xf32> to vector<2x8x8xbf16>
    "tpu.trace_start"() <{level = 10 : i32, message = "bqk,bkd->bqd"}> : () -> ()
    %cst_29 = arith.constant dense<0.000000e+00> : vector<2x8x8xf32>
    %79 = tpu.matmul %78, %62, %cst_29 {dimension_numbers = #tpu.dot_dimension_numbers<[2], [1], [1], [2], [0, 0, 0, 1, 1, 2], [0], [0]>} : vector<2x8x8xbf16>, vector<2x8x8xbf16>, vector<2x8x8xf32> -> vector<2x8x8xf32>
    "tpu.trace_stop"() : () -> ()
    %80 = vector.shape_cast %79 : vector<2x8x8xf32> to vector<16x8xf32>
    %81 = arith.truncf %80 : vector<16x8xf32> to vector<16x8xbf16>
    %82 = vector.extract_strided_slice %52 {offsets = [0, 0], sizes = [8, 32], strides = [1, 1]} : vector<32x32xbf16> to vector<8x32xbf16>
    %cst_30 = arith.constant dense<0.000000e+00> : vector<16x32xf32>
    %83 = tpu.matmul %81, %82, %cst_30 {dimension_numbers = #tpu.dot_dimension_numbers<[1], [0], [0], [1], [0, 0, 1, 1], [], []>} : vector<16x8xbf16>, vector<8x32xbf16>, vector<16x32xf32> -> vector<16x32xf32>
    %84 = arith.addf %53, %83 : vector<16x32xf32>
    %85 = vector.extract_strided_slice %41 {offsets = [0, 8], sizes = [16, 8], strides = [1, 1]} : vector<16x32xf32> to vector<16x8xf32>
    %86 = vector.shape_cast %85 : vector<16x8xf32> to vector<2x8x8xf32>
    %87 = arith.truncf %86 : vector<2x8x8xf32> to vector<2x8x8xbf16>
    %88 = vector.extract_strided_slice %42 {offsets = [0, 8], sizes = [16, 8], strides = [1, 1]} : vector<16x32xf32> to vector<16x8xf32>
    %89 = vector.shape_cast %88 : vector<16x8xf32> to vector<2x8x8xf32>
    %90 = arith.truncf %89 : vector<2x8x8xf32> to vector<2x8x8xbf16>
    %91 = vector.extract_strided_slice %43 {offsets = [0, 8], sizes = [16, 8], strides = [1, 1]} : vector<16x32xf32> to vector<16x8xf32>
    %92 = vector.shape_cast %91 : vector<16x8xf32> to vector<2x8x8xf32>
    %93 = arith.truncf %92 : vector<2x8x8xf32> to vector<2x8x8xbf16>
    "tpu.trace_start"() <{level = 10 : i32, message = "bqd,bkd->bqk"}> : () -> ()
    %cst_31 = arith.constant dense<0.000000e+00> : vector<2x8x8xf32>
    %94 = tpu.matmul %87, %90, %cst_31 {dimension_numbers = #tpu.dot_dimension_numbers<[2], [2], [1], [1], [0, 0, 0, 1, 1, 1], [0], [0]>} : vector<2x8x8xbf16>, vector<2x8x8xbf16>, vector<2x8x8xf32> -> vector<2x8x8xf32>
    %cst_32 = arith.constant -1.000000e+30 : f32
    "tpu.trace_stop"() : () -> ()
    %95 = vector.shape_cast %50 : vector<1x8x8xi1> to vector<1x8x8xi1>
    %96 = vector.broadcast %95 : vector<1x8x8xi1> to vector<2x8x8xi1>
    %97 = vector.broadcast %cst_32 : f32 to vector<2x8x8xf32>
    %98 = arith.select %96, %94, %97 : vector<2x8x8xi1>, vector<2x8x8xf32>
    %cst_33 = arith.constant dense<0xFF800000> : vector<2x8xf32>
    %99 = vector.multi_reduction <maximumf>, %98, %cst_33 [2] : vector<2x8x8xf32> to vector<2x8xf32>
    %100 = vector.shape_cast %99 : vector<2x8xf32> to vector<2x8x1xf32>
    %101 = vector.broadcast %100 : vector<2x8x1xf32> to vector<2x8x8xf32>
    %102 = arith.subf %98, %101 : vector<2x8x8xf32>
    %103 = math.exp %102 : vector<2x8x8xf32>
    %cst_34 = arith.constant dense<0.000000e+00> : vector<2x8xf32>
    %104 = vector.multi_reduction <add>, %103, %cst_34 [2] : vector<2x8x8xf32> to vector<2x8xf32>
    %105 = vector.shape_cast %104 : vector<2x8xf32> to vector<2x8x1xf32>
    %106 = tpu.reciprocal %105 {approx = true} : vector<2x8x1xf32> -> vector<2x8x1xf32>
    %107 = vector.broadcast %106 : vector<2x8x1xf32> to vector<2x8x8xf32>
    %108 = arith.mulf %103, %107 : vector<2x8x8xf32>
    %109 = arith.truncf %108 : vector<2x8x8xf32> to vector<2x8x8xbf16>
    "tpu.trace_start"() <{level = 10 : i32, message = "bqk,bkd->bqd"}> : () -> ()
    %cst_35 = arith.constant dense<0.000000e+00> : vector<2x8x8xf32>
    %110 = tpu.matmul %109, %93, %cst_35 {dimension_numbers = #tpu.dot_dimension_numbers<[2], [1], [1], [2], [0, 0, 0, 1, 1, 2], [0], [0]>} : vector<2x8x8xbf16>, vector<2x8x8xbf16>, vector<2x8x8xf32> -> vector<2x8x8xf32>
    "tpu.trace_stop"() : () -> ()
    %111 = vector.shape_cast %110 : vector<2x8x8xf32> to vector<16x8xf32>
    %112 = arith.truncf %111 : vector<16x8xf32> to vector<16x8xbf16>
    %113 = vector.extract_strided_slice %52 {offsets = [8, 0], sizes = [8, 32], strides = [1, 1]} : vector<32x32xbf16> to vector<8x32xbf16>
    %cst_36 = arith.constant dense<0.000000e+00> : vector<16x32xf32>
    %114 = tpu.matmul %112, %113, %cst_36 {dimension_numbers = #tpu.dot_dimension_numbers<[1], [0], [0], [1], [0, 0, 1, 1], [], []>} : vector<16x8xbf16>, vector<8x32xbf16>, vector<16x32xf32> -> vector<16x32xf32>
    %115 = arith.addf %84, %114 : vector<16x32xf32>
    %116 = vector.extract_strided_slice %41 {offsets = [0, 16], sizes = [16, 8], strides = [1, 1]} : vector<16x32xf32> to vector<16x8xf32>
    %117 = vector.shape_cast %116 : vector<16x8xf32> to vector<2x8x8xf32>
    %118 = arith.truncf %117 : vector<2x8x8xf32> to vector<2x8x8xbf16>
    %119 = vector.extract_strided_slice %42 {offsets = [0, 16], sizes = [16, 8], strides = [1, 1]} : vector<16x32xf32> to vector<16x8xf32>
    %120 = vector.shape_cast %119 : vector<16x8xf32> to vector<2x8x8xf32>
    %121 = arith.truncf %120 : vector<2x8x8xf32> to vector<2x8x8xbf16>
    %122 = vector.extract_strided_slice %43 {offsets = [0, 16], sizes = [16, 8], strides = [1, 1]} : vector<16x32xf32> to vector<16x8xf32>
    %123 = vector.shape_cast %122 : vector<16x8xf32> to vector<2x8x8xf32>
    %124 = arith.truncf %123 : vector<2x8x8xf32> to vector<2x8x8xbf16>
    "tpu.trace_start"() <{level = 10 : i32, message = "bqd,bkd->bqk"}> : () -> ()
    %cst_37 = arith.constant dense<0.000000e+00> : vector<2x8x8xf32>
    %125 = tpu.matmul %118, %121, %cst_37 {dimension_numbers = #tpu.dot_dimension_numbers<[2], [2], [1], [1], [0, 0, 0, 1, 1, 1], [0], [0]>} : vector<2x8x8xbf16>, vector<2x8x8xbf16>, vector<2x8x8xf32> -> vector<2x8x8xf32>
    %cst_38 = arith.constant -1.000000e+30 : f32
    "tpu.trace_stop"() : () -> ()
    %126 = vector.shape_cast %50 : vector<1x8x8xi1> to vector<1x8x8xi1>
    %127 = vector.broadcast %126 : vector<1x8x8xi1> to vector<2x8x8xi1>
    %128 = vector.broadcast %cst_38 : f32 to vector<2x8x8xf32>
    %129 = arith.select %127, %125, %128 : vector<2x8x8xi1>, vector<2x8x8xf32>
    %cst_39 = arith.constant dense<0xFF800000> : vector<2x8xf32>
    %130 = vector.multi_reduction <maximumf>, %129, %cst_39 [2] : vector<2x8x8xf32> to vector<2x8xf32>
    %131 = vector.shape_cast %130 : vector<2x8xf32> to vector<2x8x1xf32>
    %132 = vector.broadcast %131 : vector<2x8x1xf32> to vector<2x8x8xf32>
    %133 = arith.subf %129, %132 : vector<2x8x8xf32>
    %134 = math.exp %133 : vector<2x8x8xf32>
    %cst_40 = arith.constant dense<0.000000e+00> : vector<2x8xf32>
    %135 = vector.multi_reduction <add>, %134, %cst_40 [2] : vector<2x8x8xf32> to vector<2x8xf32>
    %136 = vector.shape_cast %135 : vector<2x8xf32> to vector<2x8x1xf32>
    %137 = tpu.reciprocal %136 {approx = true} : vector<2x8x1xf32> -> vector<2x8x1xf32>
    %138 = vector.broadcast %137 : vector<2x8x1xf32> to vector<2x8x8xf32>
    %139 = arith.mulf %134, %138 : vector<2x8x8xf32>
    %140 = arith.truncf %139 : vector<2x8x8xf32> to vector<2x8x8xbf16>
    "tpu.trace_start"() <{level = 10 : i32, message = "bqk,bkd->bqd"}> : () -> ()
    %cst_41 = arith.constant dense<0.000000e+00> : vector<2x8x8xf32>
    %141 = tpu.matmul %140, %124, %cst_41 {dimension_numbers = #tpu.dot_dimension_numbers<[2], [1], [1], [2], [0, 0, 0, 1, 1, 2], [0], [0]>} : vector<2x8x8xbf16>, vector<2x8x8xbf16>, vector<2x8x8xf32> -> vector<2x8x8xf32>
    "tpu.trace_stop"() : () -> ()
    %142 = vector.shape_cast %141 : vector<2x8x8xf32> to vector<16x8xf32>
    %143 = arith.truncf %142 : vector<16x8xf32> to vector<16x8xbf16>
    %144 = vector.extract_strided_slice %52 {offsets = [16, 0], sizes = [8, 32], strides = [1, 1]} : vector<32x32xbf16> to vector<8x32xbf16>
    %cst_42 = arith.constant dense<0.000000e+00> : vector<16x32xf32>
    %145 = tpu.matmul %143, %144, %cst_42 {dimension_numbers = #tpu.dot_dimension_numbers<[1], [0], [0], [1], [0, 0, 1, 1], [], []>} : vector<16x8xbf16>, vector<8x32xbf16>, vector<16x32xf32> -> vector<16x32xf32>
    %146 = arith.addf %115, %145 : vector<16x32xf32>
    %147 = vector.extract_strided_slice %41 {offsets = [0, 24], sizes = [16, 8], strides = [1, 1]} : vector<16x32xf32> to vector<16x8xf32>
    %148 = vector.shape_cast %147 : vector<16x8xf32> to vector<2x8x8xf32>
    %149 = arith.truncf %148 : vector<2x8x8xf32> to vector<2x8x8xbf16>
    %150 = vector.extract_strided_slice %42 {offsets = [0, 24], sizes = [16, 8], strides = [1, 1]} : vector<16x32xf32> to vector<16x8xf32>
    %151 = vector.shape_cast %150 : vector<16x8xf32> to vector<2x8x8xf32>
    %152 = arith.truncf %151 : vector<2x8x8xf32> to vector<2x8x8xbf16>
    %153 = vector.extract_strided_slice %43 {offsets = [0, 24], sizes = [16, 8], strides = [1, 1]} : vector<16x32xf32> to vector<16x8xf32>
    %154 = vector.shape_cast %153 : vector<16x8xf32> to vector<2x8x8xf32>
    %155 = arith.truncf %154 : vector<2x8x8xf32> to vector<2x8x8xbf16>
    "tpu.trace_start"() <{level = 10 : i32, message = "bqd,bkd->bqk"}> : () -> ()
    %cst_43 = arith.constant dense<0.000000e+00> : vector<2x8x8xf32>
    %156 = tpu.matmul %149, %152, %cst_43 {dimension_numbers = #tpu.dot_dimension_numbers<[2], [2], [1], [1], [0, 0, 0, 1, 1, 1], [0], [0]>} : vector<2x8x8xbf16>, vector<2x8x8xbf16>, vector<2x8x8xf32> -> vector<2x8x8xf32>
    %cst_44 = arith.constant -1.000000e+30 : f32
    "tpu.trace_stop"() : () -> ()
    %157 = vector.shape_cast %50 : vector<1x8x8xi1> to vector<1x8x8xi1>
    %158 = vector.broadcast %157 : vector<1x8x8xi1> to vector<2x8x8xi1>
    %159 = vector.broadcast %cst_44 : f32 to vector<2x8x8xf32>
    %160 = arith.select %158, %156, %159 : vector<2x8x8xi1>, vector<2x8x8xf32>
    %cst_45 = arith.constant dense<0xFF800000> : vector<2x8xf32>
    %161 = vector.multi_reduction <maximumf>, %160, %cst_45 [2] : vector<2x8x8xf32> to vector<2x8xf32>
    %162 = vector.shape_cast %161 : vector<2x8xf32> to vector<2x8x1xf32>
    %163 = vector.broadcast %162 : vector<2x8x1xf32> to vector<2x8x8xf32>
    %164 = arith.subf %160, %163 : vector<2x8x8xf32>
    %165 = math.exp %164 : vector<2x8x8xf32>
    %cst_46 = arith.constant dense<0.000000e+00> : vector<2x8xf32>
    %166 = vector.multi_reduction <add>, %165, %cst_46 [2] : vector<2x8x8xf32> to vector<2x8xf32>
    %167 = vector.shape_cast %166 : vector<2x8xf32> to vector<2x8x1xf32>
    %168 = tpu.reciprocal %167 {approx = true} : vector<2x8x1xf32> -> vector<2x8x1xf32>
    %169 = vector.broadcast %168 : vector<2x8x1xf32> to vector<2x8x8xf32>
    %170 = arith.mulf %165, %169 : vector<2x8x8xf32>
    %171 = arith.truncf %170 : vector<2x8x8xf32> to vector<2x8x8xbf16>
    "tpu.trace_start"() <{level = 10 : i32, message = "bqk,bkd->bqd"}> : () -> ()
    %cst_47 = arith.constant dense<0.000000e+00> : vector<2x8x8xf32>
    %172 = tpu.matmul %171, %155, %cst_47 {dimension_numbers = #tpu.dot_dimension_numbers<[2], [1], [1], [2], [0, 0, 0, 1, 1, 2], [0], [0]>} : vector<2x8x8xbf16>, vector<2x8x8xbf16>, vector<2x8x8xf32> -> vector<2x8x8xf32>
    "tpu.trace_stop"() : () -> ()
    %173 = vector.shape_cast %172 : vector<2x8x8xf32> to vector<16x8xf32>
    %174 = arith.truncf %173 : vector<16x8xf32> to vector<16x8xbf16>
    %175 = vector.extract_strided_slice %52 {offsets = [24, 0], sizes = [8, 32], strides = [1, 1]} : vector<32x32xbf16> to vector<8x32xbf16>
    %cst_48 = arith.constant dense<0.000000e+00> : vector<16x32xf32>
    %176 = tpu.matmul %174, %175, %cst_48 {dimension_numbers = #tpu.dot_dimension_numbers<[1], [0], [0], [1], [0, 0, 1, 1], [], []>} : vector<16x8xbf16>, vector<8x32xbf16>, vector<16x32xf32> -> vector<16x32xf32>
    %177 = arith.addf %146, %176 : vector<16x32xf32>
    %178 = arith.addf %4, %177 : vector<16x32xf32>
    %c0_49 = arith.constant 0 : index
    %c0_50 = arith.constant 0 : index
    %c0_51 = arith.constant 0 : index
    %179 = vector.load %arg8[%c0_49, %c0_50, %c0_51] : memref<1x1x32xf32, #tpu.memory_space<vmem>>, vector<1x1x32xf32>
    %180 = vector.shape_cast %179 : vector<1x1x32xf32> to vector<1x32xf32>
    %181 = vector.broadcast %180 : vector<1x32xf32> to vector<16x32xf32>
    %182 = arith.addf %178, %181 : vector<16x32xf32>
    %c0_52 = arith.constant 0 : index
    %c0_53 = arith.constant 0 : index
    %c0_54 = arith.constant 0 : index
    %183 = vector.load %arg9[%c0_52, %c0_53, %c0_54] : memref<1x1x32xf32, #tpu.memory_space<vmem>>, vector<1x1x32xf32>
    %184 = vector.shape_cast %183 : vector<1x1x32xf32> to vector<1x32xf32>
    %c0_55 = arith.constant 0 : index
    %c0_56 = arith.constant 0 : index
    %c0_57 = arith.constant 0 : index
    %185 = vector.load %arg10[%c0_55, %c0_56, %c0_57] : memref<1x1x32xf32, #tpu.memory_space<vmem>>, vector<1x1x32xf32>
    %186 = vector.shape_cast %185 : vector<1x1x32xf32> to vector<1x32xf32>
    %cst_58 = arith.constant dense<0.000000e+00> : vector<16xf32>
    %187 = vector.multi_reduction <add>, %182, %cst_58 [1] : vector<16x32xf32> to vector<16xf32>
    %188 = vector.shape_cast %187 : vector<16xf32> to vector<16x1xf32>
    %cst_59 = arith.constant 3.200000e+01 : f32
    %189 = vector.broadcast %cst_59 : f32 to vector<16x1xf32>
    %190 = arith.divf %188, %189 : vector<16x1xf32>
    %191 = vector.broadcast %190 : vector<16x1xf32> to vector<16x32xf32>
    %192 = arith.subf %182, %191 : vector<16x32xf32>
    %193 = arith.mulf %192, %192 : vector<16x32xf32>
    %cst_60 = arith.constant dense<0.000000e+00> : vector<16xf32>
    %194 = vector.multi_reduction <add>, %193, %cst_60 [1] : vector<16x32xf32> to vector<16xf32>
    %195 = vector.shape_cast %194 : vector<16xf32> to vector<16x1xf32>
    %cst_61 = arith.constant 3.200000e+01 : f32
    %196 = vector.broadcast %cst_61 : f32 to vector<16x1xf32>
    %197 = arith.divf %195, %196 : vector<16x1xf32>
    %198 = vector.broadcast %190 : vector<16x1xf32> to vector<16x32xf32>
    %199 = arith.subf %182, %198 : vector<16x32xf32>
    %cst_62 = arith.constant 9.99999974E-6 : f32
    %200 = vector.broadcast %cst_62 : f32 to vector<16x1xf32>
    %201 = arith.addf %197, %200 : vector<16x1xf32>
    %202 = math.rsqrt %201 : vector<16x1xf32>
    %203 = vector.broadcast %202 : vector<16x1xf32> to vector<16x32xf32>
    %204 = arith.mulf %199, %203 : vector<16x32xf32>
    %205 = vector.broadcast %184 : vector<1x32xf32> to vector<16x32xf32>
    %206 = arith.mulf %204, %205 : vector<16x32xf32>
    %207 = vector.broadcast %186 : vector<1x32xf32> to vector<16x32xf32>
    %208 = arith.addf %206, %207 : vector<16x32xf32>
    %209 = arith.truncf %208 : vector<16x32xf32> to vector<16x32xbf16>
    %c0_63 = arith.constant 0 : index
    %c0_64 = arith.constant 0 : index
    %c0_65 = arith.constant 0 : index
    %210 = vector.load %arg11[%c0_63, %c0_64, %c0_65] : memref<1x32x128xbf16, #tpu.memory_space<vmem>>, vector<1x32x128xbf16>
    %211 = vector.shape_cast %210 : vector<1x32x128xbf16> to vector<32x128xbf16>
    %cst_66 = arith.constant dense<0.000000e+00> : vector<16x128xf32>
    %212 = tpu.matmul %209, %211, %cst_66 {dimension_numbers = #tpu.dot_dimension_numbers<[1], [0], [0], [1], [0, 0, 1, 1], [], []>} : vector<16x32xbf16>, vector<32x128xbf16>, vector<16x128xf32> -> vector<16x128xf32>
    %c0_67 = arith.constant 0 : index
    %c0_68 = arith.constant 0 : index
    %c0_69 = arith.constant 0 : index
    %213 = vector.load %arg12[%c0_67, %c0_68, %c0_69] : memref<1x1x128xf32, #tpu.memory_space<vmem>>, vector<1x1x128xf32>
    %214 = vector.shape_cast %213 : vector<1x1x128xf32> to vector<1x128xf32>
    %215 = vector.broadcast %214 : vector<1x128xf32> to vector<16x128xf32>
    %216 = arith.addf %212, %215 : vector<16x128xf32>
    %217 = arith.mulf %216, %216 : vector<16x128xf32>
    %218 = arith.mulf %216, %217 : vector<16x128xf32>
    %cst_70 = arith.constant 4.471500e-02 : f32
    %219 = vector.broadcast %cst_70 : f32 to vector<16x128xf32>
    %220 = arith.mulf %219, %218 : vector<16x128xf32>
    %221 = arith.addf %216, %220 : vector<16x128xf32>
    %cst_71 = arith.constant 0.797884583 : f32
    %222 = vector.broadcast %cst_71 : f32 to vector<16x128xf32>
    %223 = arith.mulf %222, %221 : vector<16x128xf32>
    %224 = math.tanh %223 : vector<16x128xf32>
    %cst_72 = arith.constant 1.000000e+00 : f32
    %225 = vector.broadcast %cst_72 : f32 to vector<16x128xf32>
    %226 = arith.addf %225, %224 : vector<16x128xf32>
    %cst_73 = arith.constant 5.000000e-01 : f32
    %227 = vector.broadcast %cst_73 : f32 to vector<16x128xf32>
    %228 = arith.mulf %227, %226 : vector<16x128xf32>
    %229 = arith.mulf %216, %228 : vector<16x128xf32>
    %230 = arith.truncf %229 : vector<16x128xf32> to vector<16x128xbf16>
    %c0_74 = arith.constant 0 : index
    %c0_75 = arith.constant 0 : index
    %c0_76 = arith.constant 0 : index
    %231 = vector.load %arg13[%c0_74, %c0_75, %c0_76] : memref<1x128x32xbf16, #tpu.memory_space<vmem>>, vector<1x128x32xbf16>
    %232 = vector.shape_cast %231 : vector<1x128x32xbf16> to vector<128x32xbf16>
    %cst_77 = arith.constant dense<0.000000e+00> : vector<16x32xf32>
    %233 = tpu.matmul %230, %232, %cst_77 {dimension_numbers = #tpu.dot_dimension_numbers<[1], [0], [0], [1], [0, 0, 1, 1], [], []>} : vector<16x128xbf16>, vector<128x32xbf16>, vector<16x32xf32> -> vector<16x32xf32>
    %c0_78 = arith.constant 0 : index
    %c0_79 = arith.constant 0 : index
    %c0_80 = arith.constant 0 : index
    %234 = vector.load %arg14[%c0_78, %c0_79, %c0_80] : memref<1x1x32xf32, #tpu.memory_space<vmem>>, vector<1x1x32xf32>
    %235 = vector.shape_cast %234 : vector<1x1x32xf32> to vector<1x32xf32>
    %236 = vector.broadcast %235 : vector<1x32xf32> to vector<16x32xf32>
    %237 = arith.addf %233, %236 : vector<16x32xf32>
    %238 = arith.addf %182, %237 : vector<16x32xf32>
    %239 = vector.shape_cast %238 : vector<16x32xf32> to vector<2x8x32xf32>
    %c0_81 = arith.constant 0 : index
    %c0_82 = arith.constant 0 : index
    %c0_83 = arith.constant 0 : index
    %240 = vector.load %arg16[%c0_81, %c0_82, %c0_83] : memref<2x8x32xf32, #tpu.memory_space<vmem>>, vector<2x8x32xf32>
    tpu.vector_store %arg16[%c0_81, %c0_82, %c0_83], %239 {strides = array<i32>} : memref<2x8x32xf32, #tpu.memory_space<vmem>>, vector<2x8x32xf32>,
    %c1_i32_84 = arith.constant 1 : i32
    %241 = arith.cmpi eq, %arg1, %c1_i32_84 : i32
    %242 = arith.extui %241 : i1 to i32
    %c0_i32_85 = arith.constant 0 : i32
    %243 = arith.cmpi ne, %242, %c0_i32_85 : i32
    scf.if %243 {
      %244 = vector.shape_cast %238 : vector<16x32xf32> to vector<2x8x32xf32>
      %c0_86 = arith.constant 0 : index
      %c0_87 = arith.constant 0 : index
      %c0_88 = arith.constant 0 : index
      %245 = vector.load %arg15[%c0_86, %c0_87, %c0_88] : memref<2x8x32xf32, #tpu.memory_space<vmem>>, vector<2x8x32xf32>
      tpu.vector_store %arg15[%c0_86, %c0_87, %c0_88], %244 {strides = array<i32>} : memref<2x8x32xf32, #tpu.memory_space<vmem>>, vector<2x8x32xf32>,
    } else {
    }
    return
  }
  func.func @transform_0(%arg0: i32, %arg1: i32) -> (i32, i32, i32) {
    %c0_i32 = arith.constant 0 : i32
    %c0_i32_0 = arith.constant 0 : i32
    %c0_i32_1 = arith.constant 0 : i32
    return %arg0, %c0_i32, %c0_i32_0 : i32, i32, i32
  }
  func.func @transform_1(%arg0: i32, %arg1: i32) -> (i32, i32, i32) {
    %c0_i32 = arith.constant 0 : i32
    %c0_i32_0 = arith.constant 0 : i32
    %c0_i32_1 = arith.constant 0 : i32
    return %arg1, %c0_i32, %c0_i32_0 : i32, i32, i32
  }
  func.func @transform_2(%arg0: i32, %arg1: i32) -> (i32, i32, i32) {
    %c0_i32 = arith.constant 0 : i32
    %c0_i32_0 = arith.constant 0 : i32
    %c0_i32_1 = arith.constant 0 : i32
    return %arg1, %c0_i32, %c0_i32_0 : i32, i32, i32
  }
  func.func @transform_3(%arg0: i32, %arg1: i32) -> (i32, i32, i32) {
    %c0_i32 = arith.constant 0 : i32
    %c0_i32_0 = arith.constant 0 : i32
    %c0_i32_1 = arith.constant 0 : i32
    return %arg1, %c0_i32, %c0_i32_0 : i32, i32, i32
  }
  func.func @transform_4(%arg0: i32, %arg1: i32) -> (i32, i32, i32) {
    %c0_i32 = arith.constant 0 : i32
    %c0_i32_0 = arith.constant 0 : i32
    %c0_i32_1 = arith.constant 0 : i32
    return %arg1, %c0_i32, %c0_i32_0 : i32, i32, i32
  }
  func.func @transform_5(%arg0: i32, %arg1: i32) -> (i32, i32, i32) {
    %c0_i32 = arith.constant 0 : i32
    %c0_i32_0 = arith.constant 0 : i32
    %c0_i32_1 = arith.constant 0 : i32
    return %arg1, %c0_i32, %c0_i32_0 : i32, i32, i32
  }
  func.func @transform_6(%arg0: i32, %arg1: i32) -> (i32, i32, i32) {
    %c0_i32 = arith.constant 0 : i32
    %c0_i32_0 = arith.constant 0 : i32
    %c0_i32_1 = arith.constant 0 : i32
    return %arg1, %c0_i32, %c0_i32_0 : i32, i32, i32
  }
  func.func @transform_7(%arg0: i32, %arg1: i32) -> (i32, i32, i32) {
    %c0_i32 = arith.constant 0 : i32
    %c0_i32_0 = arith.constant 0 : i32
    %c0_i32_1 = arith.constant 0 : i32
    return %arg1, %c0_i32, %c0_i32_0 : i32, i32, i32
  }
  func.func @transform_8(%arg0: i32, %arg1: i32) -> (i32, i32, i32) {
    %c0_i32 = arith.constant 0 : i32
    %c0_i32_0 = arith.constant 0 : i32
    %c0_i32_1 = arith.constant 0 : i32
    return %arg1, %c0_i32, %c0_i32_0 : i32, i32, i32
  }
  func.func @transform_9(%arg0: i32, %arg1: i32) -> (i32, i32, i32) {
    %c0_i32 = arith.constant 0 : i32
    %c0_i32_0 = arith.constant 0 : i32
    %c0_i32_1 = arith.constant 0 : i32
    return %arg1, %c0_i32, %c0_i32_0 : i32, i32, i32
  }
  func.func @transform_10(%arg0: i32, %arg1: i32) -> (i32, i32, i32) {
    %c0_i32 = arith.constant 0 : i32
    %c0_i32_0 = arith.constant 0 : i32
    %c0_i32_1 = arith.constant 0 : i32
    return %arg1, %c0_i32, %c0_i32_0 : i32, i32, i32
  }
  func.func @transform_11(%arg0: i32, %arg1: i32) -> (i32, i32, i32) {
    %c0_i32 = arith.constant 0 : i32
    %c0_i32_0 = arith.constant 0 : i32
    %c0_i32_1 = arith.constant 0 : i32
    return %arg1, %c0_i32, %c0_i32_0 : i32, i32, i32
  }
  func.func @transform_12(%arg0: i32, %arg1: i32) -> (i32, i32, i32) {
    %c0_i32 = arith.constant 0 : i32
    %c0_i32_0 = arith.constant 0 : i32
    %c0_i32_1 = arith.constant 0 : i32
    return %arg1, %c0_i32, %c0_i32_0 : i32, i32, i32
  }
  func.func @transform_13(%arg0: i32, %arg1: i32) -> (i32, i32, i32) {
    %c0_i32 = arith.constant 0 : i32
    %c0_i32_0 = arith.constant 0 : i32
    %c0_i32_1 = arith.constant 0 : i32
    return %arg0, %c0_i32, %c0_i32_0 : i32, i32, i32
  }
}

</mosaic_0001>

<bundles_post_ra>
// kernel: tpu_custom_call.1
= control target key start
LH: loop header
LB: loop body
LE: loop exit
PB: predicated region body
PF: predicated region fallthrough
CT: control target
= control target key end

     0   :  { %s3254_s0 = inlined_call_operand.vmem [shape: f32[2,8,32], index: 0, kind: input, shape index: {}]   ;;  %s3255_s1 = inlined_call_operand.vmem [shape: f32[2,1,32], index: 1, kind: input, shape index: {}]   ;;  %s3256_s2 = inlined_call_operand.vmem [shape: f32[2,1,32], index: 2, kind: input, shape index: {}]   ;;  %s3257_s3 = inlined_call_operand.vmem [shape: bf16[2,32,96], index: 3, kind: input, shape index: {}]   ;;  %s3258_s4 = inlined_call_operand.vmem [shape: f32[2,1,96], index: 4, kind: input, shape index: {}]   ;;  %s3259_s5 = inlined_call_operand.vmem [shape: bf16[2,32,32], index: 5, kind: input, shape index: {}]   ;;  %s3260_s6 = inlined_call_operand.vmem [shape: f32[2,1,32], index: 6, kind: input, shape index: {}]   ;;  %s3261_s7 = inlined_call_operand.vmem [shape: f32[2,1,32], index: 7, kind: input, shape index: {}]   ;;  %s3262_s8 = inlined_call_operand.vmem [shape: f32[2,1,32], index: 8, kind: input, shape index: {}]   ;;  %s3263_s9 = inlined_call_operand.vmem [shape: bf16[2,32,128], index: 9, kind: input, shape index: {}]   ;;  %s3264_s10 = inlined_call_operand.vmem [shape: f32[2,1,128], index: 10, kind: input, shape index: {}]   ;;  %s3265_s11 = inlined_call_operand.vmem [shape: bf16[2,128,32], index: 11, kind: input, shape index: {}]   ;;  %s3266_s12 = inlined_call_operand.vmem [shape: f32[2,1,32], index: 12, kind: input, shape index: {}]   ;;  %s3267_s13 = inlined_call_operand.hbm [shape: f32[2,8,32], index: 13, kind: output, shape index: {}]  }
   0x1   :  { %3271 = sst [smem:[#allocation10_spill]] %s3257_s3 }
   0x2   :  { %3272 = sst [smem:[#allocation11_spill]] %s3259_s5 }
   0x3   :  { %3273 = sst [smem:[#allocation12_spill]] %s3267_s13 }
   0x4   :  { %18 = vsyncpa [#allocation4], 0  ;;  %s2838_s25 = smov 0   ;;  %s2840_s26 = smov 0  }
   0x5   :  { %s2842_s27 = smov 0  }
   0x6 LB: > { %3274 = sst [smem:[#allocation6_spill]] %s2746_s26  ;;  %s33_s29 = sadd.s32 1, %s2746_s26  ;;  %s2750_s27 = sphi %s2842_s27, %s24_s27   ;;  %s2746_s26 = sphi %s2840_s26, %s3291_s26   ;;  %s2742_s25 = sphi %s2838_s25, %s3290_s25  }
   0x7   : > { %3275 = sst [smem:[#allocation7_spill]] %s2750_s27  ;;  %p34_p0 = scmp.ge.s32.totalorder %s33_s29, 2 }
   0x8   : > { %p2325_p1 = scmp.ge.s32.totalorder %s2750_s27, 1  ;;  %p505_p2 = scmp.lt.s32.totalorder %s2750_s27, 3 }
   0x9   : > { %s3293_s29 = smov (%p34_p0, %s33_s29), 0 }
   0xa   : > { %3276 = sst [smem:[#allocation8_spill]] %s3293_s29  ;;  %p506_p3 = pnand %p2325_p1, %p505_p2 }
   0xc   : > { %509 = sbr.rel (%p506_p3) target bundleno = 4296 (0x10c8), region = 72 }
  0x11   : > { %p594_p4 = scmp.lt.s32.totalorder %s2742_s25, 1  ;;  %s3277_s3 = sld [smem:[#allocation10_spill]] }
  0x12   : > { %s3278_s5 = sld [smem:[#allocation11_spill]]  ;;  %p2334_p5 = scmp.ne.s32.totalorder %s2742_s25, 0 }
  0x13   : > { %s2861_s30 = scalar_select %p594_p4, %s2742_s25, 1 }
  0x15   : > { %s2383_s20 = sshll.u32 %s2861_s30, 4  ;;  %s618_s27 = scalar_lea.vmem %s3261_s7, %s2861_s30 }
  0x16   : > { %s621_s23 = scalar_lea.vmem %s3262_s8, %s2861_s30  ;;  %s637_s21 = scalar_lea.vmem %s3266_s12, %s2861_s30 }
  0x17   : > { %s2879_s15 = scalar_lea.vmem %s3277_s3, %s2383_s20  ;;  %s2901_s3 = scalar_lea.vmem %s3263_s9, %s2383_s20 }
  0x18   : > { %s2884_s26 = scalar_lea.vmem %s3278_s5, %s2383_s20  ;;  %s629_s5 = scalar_lea.vmem %s3264_s10, %s2861_s30 }
  0x19   : > { %3279 = sst [smem:[#allocation9_spill]] %s2884_s26  ;;  %s2386_s26 = sshll.u32 %s2861_s30, 6 }
  0x1a   : > { %s2911_s17 = scalar_lea.vmem %s3265_s11, %s2386_s26  ;;  %643 = sbr.rel (%p2334_p5) target bundleno = 33 (0x21), region = 76 }
  0x1f   : > { %v644_v0 = vld [vmem:[%s3254_s0] sm:$0xff]  ;;  %vm646_vm0 = vcmask 261120   ;;  %v645_v1 = vld [vmem:[%s3254_s0 + $0x8] sm:$0xff] }
  0x20   : > { %647 = vst.msk [vmem:[#allocation2] sm:$0xff] %vm646_vm0, %v644_v0  ;;  %648 = vst.msk [vmem:[#allocation2 + $0x8] sm:$0xff] %vm646_vm0, %v645_v1 }
  0x21 PF: > { %vm653_vm1 = vcmask 261120   ;;  %v2644_v16 = vld [vmem:[%s2879_s15 + $0x8] sm:$0xff]   ;;  %v2752_v17 = vmov 0.0   ;;  %vm2753_vm2 = vmmov 0   ;;  %v2645_v18 = vld [vmem:[%s2879_s15] sm:$0xff]   ;;  %s3280_s28 = scalar_lea.vmem %s3255_s1, %s2861_s30  ;;  %s3281_s16 = scalar_lea.vmem %s3256_s2, %s2861_s30  ;;  %vm787_vm3 = vcmask 64512  }
  0x22   : > { %2442 = vmatprep.subr.bf16.mxu1 %v2752_v17  ;;  %2446 = vmatprep.mubr.msk.bf16.mxu1 %vm2753_vm2, %v2752_v17  ;;  %v2335_v27 = vld [vmem:[%s3280_s28] ss:$0 sm:$0xff]  ;;  %s3282_s22 = scalar_lea.vmem %s3258_s4, %s2861_s30  ;;  %s2754_s20 = smov 96   ;;  %v767_v53 = vlaneseq  ;;  %vm916_vm5 = vcmask 1043456  }
  0x23   : > { %2443 = vmatpush3.bf16.msra.mxu1 %v2644_v16  ;;  %2468 = vmatprep.subr.bf16.mxu0 %v2752_v17  ;;  %v2336_v31 = vld [vmem:[%s3281_s16] ss:$0 sm:$0xff]  ;;  %s2755_s24 = smov 64   ;;  %s2756_s14 = smov 88  }
  0x24   : > { %2444 = vmatprep.subr.bf16.mxu1 %v2752_v17  ;;  %2470 = vmatprep.mubr.msk.bf16.mxu0 %vm2753_vm2, %v2752_v17  ;;  %v2337_v36 = vld [vmem:[%s3282_s22] ss:$0 sm:$0xff]  ;;  %v768_v54 = vshrl.u32 %v767_v53, 7  ;;  %v770_v55 = vand.u32 127, %v767_v53  ;;  %s2757_s26 = smov 120   ;;  %s2758_s15 = smov 56  }
  0x25   : > { %s2759_s28 = smov 80   ;;  %s2760_s29 = smov 112  }
  0x26   : > { %v771_v56 = vsub.s32 %v768_v54, %v770_v55  ;;  %s3283_s13 = sld [smem:[#allocation9_spill]]  ;;  %s2761_s16 = smov 48  }
  0x27   : > { %v2924_v2 = vld [vmem:[#allocation2] sm:$0xff]  ;;  %v2926_v3 = vld [vmem:[#allocation2 + $0x8] sm:$0xff]  ;;  %2445 = vmatpush3.bf16.msra.mxu1 %v2645_v18  ;;  %s2762_s19 = smov 72   ;;  %s2763_s18 = smov 104  }
  0x28   : > { %v654_v4 = vsel %vm653_vm1, %v2924_v2, 0.0  ;;  %v657_v5 = vsel %vm653_vm1, %v2926_v3, 0.0  ;;  %2450 = vmatprep.subr.bf16.mxu1 %v2752_v17  ;;  %v773_v57 = vsub.s32 0, %v771_v56  ;;  %s2764_s22 = smov 40   ;;  %p2378_p6 = scmp.ne.s32.totalorder %s2742_s25, 1 }
  0x29   : > { %655 = vadd.xlane.f32.xlu0 %v654_v4 }
  0x2a   : > { %v2986_v58 = vmin.u32 %v773_v57, %v771_v56 }
  0x2c   : > { %vm775_vm4 = vcmp.le.s32.totalorder %v2986_v58, 1 }
  0x2d   : > { %658 = vadd.xlane.f32.xlu0 %v657_v5 }
  0xb2   : > { %v656_v6 = vpop.xlane.xlu0 %655 }
  0xb3   : > { %v661_v7 = vmul.f32 0.03125, %v656_v6 }
  0xb5   : > { %v663_v8 = vsub.f32 %v2924_v2, %v661_v7 }
  0xb6   : > { %v659_v9 = vpop.xlane.xlu0 %658 }
  0xb7   : > { %v662_v10 = vmul.f32 0.03125, %v659_v9  ;;  %v665_v11 = vmul.f32 %v663_v8, %v663_v8 }
  0xb9   : > { %v664_v12 = vsub.f32 %v2926_v3, %v662_v10  ;;  %v667_v13 = vsel %vm653_vm1, %v665_v11, 0.0 }
  0xba   : > { %668 = vadd.xlane.f32.xlu1 %v667_v13 }
  0xbb   : > { %v666_v14 = vmul.f32 %v664_v12, %v664_v12 }
  0xbd   : > { %v670_v15 = vsel %vm653_vm1, %v666_v14, 0.0 }
  0xbe   : > { %671 = vadd.xlane.f32.xlu1 %v670_v15 }
 0x143   : > { %v669_v19 = vpop.xlane.xlu1 %668 }
 0x144   : > { %v673_v20 = vmul.f32 0.03125, %v669_v19 }
 0x146   : > { %v675_v21 = vadd.f32 1e-05, %v673_v20 }
 0x147   : > { %v672_v22 = vpop.xlane.xlu1 %671 }
 0x148   : > { %2656 = vrsqrt.f32 %v675_v21  ;;  %v674_v23 = vmul.f32 0.03125, %v672_v22 }
 0x14a   : > { %v676_v24 = vadd.f32 1e-05, %v674_v23 }
 0x14c   : > { %2658 = vrsqrt.f32 %v676_v24 }
 0x155   : > { %v2657_v25 = vpop.eup %2656 }
 0x156   : > { %v679_v26 = vmul.f32 %v2657_v25, %v663_v8 }
 0x158   : > { %v687_v30 = vmul.f32 %v2335_v27, %v679_v26 }
 0x159   : > { %v2659_v28 = vpop.eup %2658 }
 0x15a   : > { %v680_v29 = vmul.f32 %v2659_v28, %v664_v12  ;;  %v695_v33 = vadd.f32 %v2336_v31, %v687_v30 }
 0x15c   : > { %v688_v32 = vmul.f32 %v2335_v27, %v680_v29 }
 0x15e   : > { %v696_v34 = vadd.f32 %v2336_v31, %v688_v32 }
 0x160   : > { %v697_v35 = vpack.c.bf16 %v696_v34, %v695_v33 }
 0x162   : > { %2447 = vmatmul.mubr.msk.bf16.vlgmr.msra.gmra.mxu1 %vm653_vm1, %v697_v35 }
 0x163   : > { %2452 = vmatprep.mubr.msk.bf16.mxu1 %vm2753_vm2, %v2752_v17 }
 0x222   : > { %v758_v37 = vpop.f32.mrf.mxu1 }
 0x223   : > { %v759_v38 = vadd.f32 %v2337_v36, %v758_v37 }
 0x224   : > { %v2448_v39 = vpop.f32.mrf.mxu1 }
 0x225   : > { %v2964_v40 = vpack.c.bf16 %v759_v38, %v759_v38  ;;  %v765_v47 = vmul.f32 0.35355338, %v759_v38 }
 0x226   : > { %v761_v41 = vpop.f32.mrf.mxu1 }
 0x227   : > { %v762_v42 = vadd.f32 %v2337_v36, %v761_v41  ;;  %785 = vrot.lane.b32.xlu0 %v2964_v40, %s2754_s20  ;;  %v2972_v49 = vpack.c.bf16 %v765_v47, %v765_v47 }
 0x228   : > { %v2449_v43 = vpop.f32.mrf.mxu1 }
 0x229   : > { %v2967_v44 = vpack.c.bf16 %v762_v42, %v762_v42  ;;  %v766_v51 = vmul.f32 0.35355338, %v762_v42 }
 0x22b   : > { %835 = vrot.lane.b32.xlu1 %v2967_v44, %s2754_s20  ;;  %v2980_v52 = vpack.c.bf16 %v766_v51, %v766_v51 }
 0x299   : > { %v786_v45 = vpop.permute.xlu0 %785 }
 0x29a   : > { %v792_v46 = vsel %vm787_vm3, %v786_v45, 0 }
 0x29b   : > { %2451 = vmatpush3.bf16.xpose.msra.mxu1 %v792_v46 }
 0x29c   : > { %2456 = vmatprep.subr.bf16.mxu1 %v2752_v17 }
 0x29d   : > { %v836_v48 = vpop.permute.xlu1 %835 }
 0x29e   : > { %v841_v50 = vsel %vm787_vm3, %v836_v48, 0 }
 0x2a2   : > { %2453 = vmatmul.mubr.msk.bf16.vlgmr.msra.gmra.mxu1 %vm787_vm3, %v2972_v49 }
 0x2a3   : > { %2457 = vmatpush3.bf16.xpose.msra.mxu1 %v841_v50  ;;  %2458 = vmatprep.mubr.msk.bf16.mxu1 %vm2753_vm2, %v2752_v17 }
 0x2a4   : > { %2462 = vmatprep.subr.bf16.mxu1 %v2752_v17 }
 0x2aa   : > { %2459 = vmatmul.mubr.msk.bf16.vlgmr.msra.gmra.mxu1 %vm787_vm3, %v2980_v52 }
 0x2ab   : > { %2464 = vmatprep.mubr.msk.bf16.mxu1 %vm2753_vm2, %v2752_v17 }
 0x362   : > { %v828_v59 = vpop.f32.mrf.mxu1 }
 0x363   : > { %v885_v60 = vsel %vm775_vm4, %v828_v59, -1e+30 }
 0x364   : > { %v2454_v61 = vpop.f32.mrf.mxu1  ;;  %v887_v62 = vsel %vm787_vm3, %v885_v60, -inf }
 0x365   : > { %888 = vmax.xlane.f32.xlu1 %v887_v62 }
 0x366   : > { %v831_v63 = vpop.f32.mrf.mxu1 }
 0x368   : > { %v2455_v0 = vpop.f32.mrf.mxu1 }
 0x36a   : > { %v877_v1 = vpop.f32.mrf.mxu1 }
 0x36b   : > { %v886_v4 = vsel %vm775_vm4, %v877_v1, -1e+30 }
 0x36c   : > { %v2460_v5 = vpop.f32.mrf.mxu1  ;;  %v890_v6 = vsel %vm787_vm3, %v886_v4, -inf }
 0x36d   : > { %891 = vmax.xlane.f32.xlu0 %v890_v6 }
 0x36e   : > { %v880_v7 = vpop.f32.mrf.mxu1 }
 0x370   : > { %v2461_v8 = vpop.f32.mrf.mxu1 }
 0x376   : > { %960 = vrot.lane.b32.xlu1 %v2967_v44, %s2755_s24 }
 0x37a   : > { %1012 = vrot.lane.b32.xlu1 %v2964_v40, %s2756_s14 }
 0x3ee   : > { %v889_v9 = vpop.xlane.xlu1 %888 }
 0x3ef   : > { %v893_v10 = vsub.f32 %v885_v60, %v889_v9 }
 0x3f1   : > { %v895_v11 = vmul.f32 1.442695, %v893_v10 }
 0x3f2   : > { %v961_v12 = vpop.permute.xlu1 %960 }
 0x3f3   : > { %2660 = vpow2.f32 %v895_v11  ;;  %v966_v13 = vsel %vm916_vm5, %v961_v12, 0 }
 0x3f4   : > { %2469 = vmatpush3.bf16.msra.mxu0 %v966_v13 }
 0x3f5   : > { %2480 = vmatprep.subr.bf16.mxu0 %v2752_v17 }
 0x3f6   : > { %v892_v14 = vpop.xlane.xlu0 %891  ;;  %v1013_v23 = vpop.permute.xlu1 %1012 }
 0x3f7   : > { %v894_v15 = vsub.f32 %v886_v4, %v892_v14  ;;  %v1018_v30 = vsel %vm787_vm3, %v1013_v23, 0  ;;  %v776_v23 = vld [vmem:[%s3283_s13] sm:$0xf] }
 0x3f9   : > { %v897_v16 = vmul.f32 1.442695, %v894_v15 }
 0x3fb   : > { %2662 = vpow2.f32 %v897_v16 }
 0x400   : > { %v2661_v18 = vpop.eup %2660 }
 0x401   : > { %v899_v19 = vsel %vm787_vm3, %v2661_v18, 0.0 }
 0x402   : > { %900 = vadd.xlane.f32.xlu0 %v899_v19 }
 0x408   : > { %v2663_v20 = vpop.eup %2662 }
 0x409   : > { %v902_v21 = vsel %vm787_vm3, %v2663_v20, 0.0 }
 0x40a   : > { %903 = vadd.xlane.f32.xlu1 %v902_v21 }
 0x418   : > { %911 = vrot.lane.b32.xlu0 %v2964_v40, %s2755_s24 }
 0x41b   : > { %1063 = vrot.lane.b32.xlu1 %v2967_v44, %s2756_s14  ;;  %s3284_s14 = scalar_lea.vmem %s3260_s6, %s2861_s30 }
 0x41c   : > { %1010 = vrot.lane.b32.xlu0 %v2972_v49, %s2757_s26 }
 0x41f   : > { %1061 = vrot.lane.b32.xlu1 %v2980_v52, %s2757_s26 }
 0x48b   : > { %v901_v22 = vpop.xlane.xlu0 %900 }
 0x48c   : > { %2664 = vrcp.f32 %v901_v22 }
 0x48f   : > { %v912_v24 = vpop.permute.xlu0 %911 }
 0x490   : > { %v918_v25 = vsel %vm916_vm5, %v912_v24, 0 }
 0x491   : > { %2463 = vmatpush3.bf16.msra.mxu1 %v918_v25 }
 0x492   : > { %2474 = vmatprep.subr.bf16.mxu1 %v2752_v17 }
 0x493   : > { %v904_v26 = vpop.xlane.xlu1 %903  ;;  %v1011_v35 = vpop.permute.xlu0 %1010 }
 0x494   : > { %2666 = vrcp.f32 %v904_v26  ;;  %v1285_v26 = vsel %vm916_vm5, %v776_v23, 0 }
 0x497   : > { %v1064_v33 = vpop.permute.xlu1 %1063 }
 0x498   : > { %v1069_v36 = vsel %vm787_vm3, %v1064_v33, 0 }
 0x499   : > { %v2665_v27 = vpop.eup %2664 }
 0x49a   : > { %v907_v28 = vmul.f32 %v2665_v27, %v2661_v18 }
 0x49b   : > { %v1062_v37 = vpop.permute.xlu1 %1061 }
 0x49c   : > { %v909_v29 = vpack.c.bf16 %v907_v28, %v907_v28 }
 0x49e   : > { %2465 = vmatmul.mubr.msk.bf16.vlgmr.msra.gmra.mxu1 %vm787_vm3, %v909_v29 }
 0x49f   : > { %2475 = vmatpush3.bf16.xpose.msra.mxu1 %v1018_v30  ;;  %2476 = vmatprep.mubr.msk.bf16.mxu1 %vm2753_vm2, %v2752_v17 }
 0x4a0   : > { %2486 = vmatprep.subr.bf16.mxu1 %v2752_v17 }
 0x4a1   : > { %v2667_v31 = vpop.eup %2666 }
 0x4a2   : > { %v908_v32 = vmul.f32 %v2667_v31, %v2663_v20  ;;  %v777_v31 = vld [vmem:[%s3283_s13 + $0x4] sm:$0xf] }
 0x4a4   : > { %v910_v34 = vpack.c.bf16 %v908_v32, %v908_v32  ;;  %v1238_v32 = vsel %vm916_vm5, %v777_v31, 0 }
 0x4a6   : > { %2471 = vmatmul.mubr.msk.bf16.vlgmr.msra.gmra.mxu0 %vm787_vm3, %v910_v34  ;;  %2477 = vmatmul.mubr.msk.bf16.vlgmr.msra.gmra.mxu1 %vm787_vm3, %v1011_v35 }
 0x4a7   : > { %2481 = vmatpush3.bf16.xpose.msra.mxu0 %v1069_v36  ;;  %2482 = vmatprep.mubr.msk.bf16.mxu0 %vm2753_vm2, %v2752_v17 }
 0x4a8   : > { %2492 = vmatprep.subr.bf16.mxu0 %v2752_v17  ;;  %2488 = vmatprep.mubr.msk.bf16.mxu1 %vm2753_vm2, %v2752_v17 }
 0x4ae   : > { %2483 = vmatmul.mubr.msk.bf16.vlgmr.msra.gmra.mxu0 %vm787_vm3, %v1062_v37 }
 0x4af   : > { %2494 = vmatprep.mubr.msk.bf16.mxu0 %vm2753_vm2, %v2752_v17 }
 0x55e   : > { %v3023_v38 = vpop.f32.mrf.mxu1 }
 0x560   : > { %v2466_v39 = vpop.f32.mrf.mxu1 }
 0x562   : > { %v957_v41 = vpop.f32.mrf.mxu1 }
 0x564   : > { %v2467_v42 = vpop.f32.mrf.mxu1 }
 0x566   : > { %v3025_v43 = vpop.f32.mrf.mxu0  ;;  %v1054_v45 = vpop.f32.mrf.mxu1 }
 0x567   : > { %v1008_v46 = vpack.c.bf16 %v3025_v43, %v3023_v38  ;;  %v1111_v47 = vsel %vm775_vm4, %v1054_v45, -1e+30 }
 0x568   : > { %v2472_v48 = vpop.f32.mrf.mxu0  ;;  %v2478_v50 = vpop.f32.mrf.mxu1  ;;  %v1113_v51 = vsel %vm787_vm3, %v1111_v47, -inf }
 0x569   : > { %1114 = vmax.xlane.f32.xlu0 %v1113_v51 }
 0x56a   : > { %v1005_v53 = vpop.f32.mrf.mxu0  ;;  %v1057_v54 = vpop.f32.mrf.mxu1 }
 0x56c   : > { %v2473_v55 = vpop.f32.mrf.mxu0  ;;  %v2479_v56 = vpop.f32.mrf.mxu1 }
 0x56e   : > { %v1105_v57 = vpop.f32.mrf.mxu0 }
 0x56f   : > { %v1112_v59 = vsel %vm775_vm4, %v1105_v57, -1e+30 }
 0x570   : > { %v2484_v60 = vpop.f32.mrf.mxu0  ;;  %v1116_v61 = vsel %vm787_vm3, %v1112_v59, -inf }
 0x571   : > { %1117 = vmax.xlane.f32.xlu1 %v1116_v61 }
 0x572   : > { %v1108_v62 = vpop.f32.mrf.mxu0 }
 0x574   : > { %v2485_v63 = vpop.f32.mrf.mxu0 }
 0x582   : > { %1185 = vrot.lane.b32.xlu1 %v2967_v44, %s2758_s15 }
 0x586   : > { %1330 = vrot.lane.b32.xlu1 %v2964_v40, %s2759_s28 }
 0x58a   : > { %1380 = vrot.lane.b32.xlu1 %v2967_v44, %s2759_s28 }
 0x58e   : > { %1378 = vrot.lane.b32.xlu1 %v2980_v52, %s2760_s29 }
 0x5f2   : > { %v1115_v0 = vpop.xlane.xlu0 %1114 }
 0x5f3   : > { %v1119_v1 = vsub.f32 %v1111_v47, %v1115_v0 }
 0x5f5   : > { %v1121_v4 = vmul.f32 1.442695, %v1119_v1 }
 0x5f7   : > { %2668 = vpow2.f32 %v1121_v4 }
 0x5fa   : > { %v1118_v5 = vpop.xlane.xlu1 %1117 }
 0x5fb   : > { %v1120_v6 = vsub.f32 %v1112_v59, %v1118_v5 }
 0x5fd   : > { %v1123_v7 = vmul.f32 1.442695, %v1120_v6 }
 0x5fe   : > { %v1186_v8 = vpop.permute.xlu1 %1185 }
 0x5ff   : > { %2670 = vpow2.f32 %v1123_v7  ;;  %v1191_v9 = vsel %vm916_vm5, %v1186_v8, 0 }
 0x600   : > { %2493 = vmatpush3.bf16.msra.mxu0 %v1191_v9 }
 0x601   : > { %2504 = vmatprep.subr.bf16.mxu0 %v2752_v17 }
 0x602   : > { %v1331_v27 = vpop.permute.xlu1 %1330 }
 0x603   : > { %v1336_v41 = vsel %vm787_vm3, %v1331_v27, 0 }
 0x604   : > { %v2669_v10 = vpop.eup %2668 }
 0x605   : > { %v1125_v11 = vsel %vm787_vm3, %v2669_v10, 0.0 }
 0x606   : > { %1126 = vadd.xlane.f32.xlu0 %v1125_v11  ;;  %v1381_v28 = vpop.permute.xlu1 %1380 }
 0x607   : > { %v1386_v29 = vsel %vm787_vm3, %v1381_v28, 0 }
 0x60a   : > { %v1379_v30 = vpop.permute.xlu1 %1378 }
 0x60c   : > { %v2671_v12 = vpop.eup %2670 }
 0x60d   : > { %v1128_v13 = vsel %vm787_vm3, %v2671_v12, 0.0 }
 0x60e   : > { %1129 = vadd.xlane.f32.xlu0 %v1128_v13 }
 0x624   : > { %1137 = vrot.lane.b32.xlu0 %v2964_v40, %s2758_s15 }
 0x628   : > { %1328 = vrot.lane.b32.xlu0 %v2972_v49, %s2760_s29 }
 0x68f   : > { %v1127_v14 = vpop.xlane.xlu0 %1126 }
 0x690   : > { %2672 = vrcp.f32 %v1127_v14 }
 0x697   : > { %v1130_v15 = vpop.xlane.xlu0 %1129 }
 0x698   : > { %2674 = vrcp.f32 %v1130_v15 }
 0x69b   : > { %v1138_v16 = vpop.permute.xlu0 %1137 }
 0x69c   : > { %v1143_v18 = vsel %vm916_vm5, %v1138_v16, 0 }
 0x69d   : > { %v2673_v19 = vpop.eup %2672  ;;  %2487 = vmatpush3.bf16.msra.mxu1 %v1143_v18 }
 0x69e   : > { %v1133_v20 = vmul.f32 %v2673_v19, %v2669_v10  ;;  %2498 = vmatprep.subr.bf16.mxu1 %v2752_v17 }
 0x6a0   : > { %v1135_v21 = vpack.c.bf16 %v1133_v20, %v1133_v20 }
 0x6a2   : > { %2489 = vmatmul.mubr.msk.bf16.vlgmr.msra.gmra.mxu1 %vm787_vm3, %v1135_v21 }
 0x6a3   : > { %2500 = vmatprep.mubr.msk.bf16.mxu1 %vm2753_vm2, %v2752_v17  ;;  %2499 = vmatpush3.bf16.msra.mxu1 %v1238_v32 }
 0x6a4   : > { %2510 = vmatprep.subr.bf16.mxu1 %v2752_v17 }
 0x6a5   : > { %v2675_v22 = vpop.eup %2674 }
 0x6a6   : > { %v1134_v24 = vmul.f32 %v2675_v22, %v2671_v12 }
 0x6a8   : > { %v1136_v25 = vpack.c.bf16 %v1134_v24, %v1134_v24 }
 0x6aa   : > { %2495 = vmatmul.mubr.msk.bf16.vlgmr.msra.gmra.mxu0 %vm787_vm3, %v1136_v25 }
 0x6ab   : > { %2505 = vmatpush3.bf16.msra.mxu0 %v1285_v26  ;;  %2506 = vmatprep.mubr.msk.bf16.mxu0 %vm2753_vm2, %v2752_v17 }
 0x6ac   : > { %2516 = vmatprep.subr.bf16.mxu0 %v2752_v17 }
 0x6b2   : > { %2507 = vmatmul.mubr.msk.bf16.vlgmr.msra.gmra.mxu0 %vm787_vm3, %v1008_v46  ;;  %v1329_v46 = vpop.permute.xlu0 %1328 }
 0x6b3   : > { %2517 = vmatpush3.bf16.xpose.msra.mxu0 %v1386_v29  ;;  %2518 = vmatprep.mubr.msk.bf16.mxu0 %vm2753_vm2, %v2752_v17 }
 0x6b4   : > { %2528 = vmatprep.subr.bf16.mxu0 %v2752_v17 }
 0x6ba   : > { %2519 = vmatmul.mubr.msk.bf16.vlgmr.msra.gmra.mxu0 %vm787_vm3, %v1379_v30 }
 0x6bb   : > { %2530 = vmatprep.mubr.msk.bf16.mxu0 %vm2753_vm2, %v2752_v17 }
 0x762   : > { %v1179_v33 = vpop.f32.mrf.mxu1 }
 0x764   : > { %v2490_v34 = vpop.f32.mrf.mxu1 }
 0x766   : > { %v1182_v35 = vpop.f32.mrf.mxu1 }
 0x767   : > { %v778_v35 = vld [vmem:[%s3283_s13 + $0x8] sm:$0xf] }
 0x768   : > { %v2491_v36 = vpop.f32.mrf.mxu1 }
 0x769   : > { %v1555_v36 = vsel %vm916_vm5, %v778_v35, 0 }
 0x76a   : > { %v1227_v37 = vpop.f32.mrf.mxu0 }
 0x76b   : > { %v1233_v38 = vpack.c.bf16 %v1227_v37, %v1179_v33 }
 0x76c   : > { %v2496_v39 = vpop.f32.mrf.mxu0 }
 0x76d   : > { %2501 = vmatmul.mubr.msk.bf16.vlgmr.msra.gmra.mxu1 %vm787_vm3, %v1233_v38 }
 0x76e   : > { %2511 = vmatpush3.bf16.xpose.msra.mxu1 %v1336_v41  ;;  %v1230_v42 = vpop.f32.mrf.mxu0  ;;  %2512 = vmatprep.mubr.msk.bf16.mxu1 %vm2753_vm2, %v2752_v17 }
 0x76f   : > { %2522 = vmatprep.subr.bf16.mxu1 %v2752_v17 }
 0x770   : > { %v2497_v43 = vpop.f32.mrf.mxu0 }
 0x772   : > { %v3075_v45 = vpop.f32.mrf.mxu0 }
 0x774   : > { %v2508_v47 = vpop.f32.mrf.mxu0 }
 0x775   : > { %2513 = vmatmul.mubr.msk.bf16.vlgmr.msra.gmra.mxu1 %vm787_vm3, %v1329_v46 }
 0x776   : > { %v3078_v48 = vpop.f32.mrf.mxu0  ;;  %2524 = vmatprep.mubr.msk.bf16.mxu1 %vm2753_vm2, %v2752_v17 }
 0x778   : > { %v2509_v50 = vpop.f32.mrf.mxu0 }
 0x77a   : > { %v1422_v51 = vpop.f32.mrf.mxu0 }
 0x77b   : > { %v1429_v53 = vsel %vm775_vm4, %v1422_v51, -1e+30 }
 0x77c   : > { %v2520_v54 = vpop.f32.mrf.mxu0  ;;  %v1433_v55 = vsel %vm787_vm3, %v1429_v53, -inf }
 0x77d   : > { %1434 = vmax.xlane.f32.xlu1 %v1433_v55 }
 0x77e   : > { %v1425_v56 = vpop.f32.mrf.mxu0 }
 0x780   : > { %v2521_v57 = vpop.f32.mrf.mxu0 }
 0x78e   : > { %1502 = vrot.lane.b32.xlu1 %v2967_v44, %s2761_s16 }
 0x792   : > { %1602 = vrot.lane.b32.xlu1 %v2964_v40, %s2762_s19 }
 0x796   : > { %1652 = vrot.lane.b32.xlu1 %v2967_v44, %s2762_s19 }
 0x79a   : > { %1650 = vrot.lane.b32.xlu1 %v2980_v52, %s2763_s18 }
 0x806   : > { %v1435_v59 = vpop.xlane.xlu1 %1434 }
 0x807   : > { %v1437_v62 = vsub.f32 %v1429_v53, %v1435_v59 }
 0x809   : > { %v1440_v63 = vmul.f32 1.442695, %v1437_v62 }
 0x80a   : > { %v1503_v60 = vpop.permute.xlu1 %1502 }
 0x80b   : > { %v1508_v61 = vsel %vm916_vm5, %v1503_v60, 0  ;;  %2676 = vpow2.f32 %v1440_v63 }
 0x80c   : > { %2529 = vmatpush3.bf16.msra.mxu0 %v1508_v61 }
 0x80d   : > { %2540 = vmatprep.subr.bf16.mxu0 %v2752_v17 }
 0x80e   : > { %v1603_v22 = vpop.permute.xlu1 %1602 }
 0x80f   : > { %v1608_v24 = vsel %vm787_vm3, %v1603_v22, 0 }
 0x812   : > { %v1653_v46 = vpop.permute.xlu1 %1652 }
 0x813   : > { %v1658_v53 = vsel %vm787_vm3, %v1653_v46, 0 }
 0x816   : > { %v1651_v56 = vpop.permute.xlu1 %1650 }
 0x818   : > { %v2677_v9 = vpop.eup %2676 }
 0x819   : > { %v1445_v12 = vsel %vm787_vm3, %v2677_v9, 0.0 }
 0x82d   : > { %v3093_v0 = vpop.f32.mrf.mxu1 }
 0x82e   : > { %v1322_v63 = vadd.f32 %v3075_v45, %v3093_v0 }
 0x82f   : > { %v2502_v1 = vpop.f32.mrf.mxu1 }
 0x831   : > { %v3095_v4 = vpop.f32.mrf.mxu1 }
 0x833   : > { %v2503_v5 = vpop.f32.mrf.mxu1 }
 0x835   : > { %v1372_v6 = vpop.f32.mrf.mxu1 }
 0x836   : > { %v1428_v52 = vsel %vm775_vm4, %v1372_v6, -1e+30 }
 0x837   : > { %v2514_v7 = vpop.f32.mrf.mxu1  ;;  %v1430_v8 = vsel %vm787_vm3, %v1428_v52, -inf }
 0x838   : > { %1431 = vmax.xlane.f32.xlu0 %v1430_v8 }
 0x839   : > { %v1375_v10 = vpop.f32.mrf.mxu1 }
 0x83b   : > { %v2515_v11 = vpop.f32.mrf.mxu1 }
 0x83c   : > { %1446 = vadd.xlane.f32.xlu0 %v1445_v12 }
 0x8c1   : > { %v1432_v13 = vpop.xlane.xlu0 %1431 }
 0x8c2   : > { %v1436_v14 = vsub.f32 %v1428_v52, %v1432_v13  ;;  %v1325_v52 = vadd.f32 %v3078_v48, %v3095_v4 }
 0x8c4   : > { %v1438_v15 = vmul.f32 1.442695, %v1436_v14 }
 0x8c5   : > { %v1447_v16 = vpop.xlane.xlu0 %1446 }
 0x8c6   : > { %2678 = vpow2.f32 %v1438_v15 }
 0x8c7   : > { %2680 = vrcp.f32 %v1447_v16 }
 0x8d3   : > { %v2679_v18 = vpop.eup %2678 }
 0x8d4   : > { %v2681_v19 = vpop.eup %2680  ;;  %v1442_v20 = vsel %vm787_vm3, %v2679_v18, 0.0 }
 0x8d5   : > { %1443 = vadd.xlane.f32.xlu0 %v1442_v20  ;;  %v1451_v21 = vmul.f32 %v2681_v19, %v2677_v9 }
 0x8d7   : > { %v1453_v23 = vpack.c.bf16 %v1451_v21, %v1451_v21 }
 0x8d9   : > { %2531 = vmatmul.mubr.msk.bf16.vlgmr.msra.gmra.mxu0 %vm787_vm3, %v1453_v23 }
 0x8da   : > { %2541 = vmatpush3.bf16.xpose.msra.mxu0 %v1608_v24  ;;  %2542 = vmatprep.mubr.msk.bf16.mxu0 %vm2753_vm2, %v2752_v17 }
 0x8db   : > { %2552 = vmatprep.subr.bf16.mxu0 %v2752_v17 }
 0x8eb   : > { %1454 = vrot.lane.b32.xlu0 %v2964_v40, %s2761_s16 }
 0x8ef   : > { %1600 = vrot.lane.b32.xlu0 %v2972_v49, %s2763_s18 }
 0x95e   : > { %v1444_v25 = vpop.xlane.xlu0 %1443 }
 0x95f   : > { %2682 = vrcp.f32 %v1444_v25 }
 0x962   : > { %v1455_v26 = vpop.permute.xlu0 %1454 }
 0x963   : > { %v1460_v27 = vsel %vm916_vm5, %v1455_v26, 0 }
 0x964   : > { %2523 = vmatpush3.bf16.msra.mxu1 %v1460_v27  ;;  %v779_v27 = vld [vmem:[%s3283_s13 + $0xc] sm:$0xf] }
 0x965   : > { %2534 = vmatprep.subr.bf16.mxu1 %v2752_v17 }
 0x966   : > { %v1601_v28 = vpop.permute.xlu0 %1600 }
 0x967   : > { %2543 = vmatmul.mubr.msk.bf16.vlgmr.msra.gmra.mxu0 %vm787_vm3, %v1601_v28  ;;  %v1827_v28 = vsel %vm916_vm5, %v779_v27, 0 }
 0x968   : > { %2554 = vmatprep.mubr.msk.bf16.mxu0 %vm2753_vm2, %v2752_v17 }
 0x96c   : > { %v2683_v29 = vpop.eup %2682 }
 0x96d   : > { %v1450_v30 = vmul.f32 %v2683_v29, %v2679_v18 }
 0x96f   : > { %v1452_v31 = vpack.c.bf16 %v1450_v30, %v1450_v30 }
 0x971   : > { %2525 = vmatmul.mubr.msk.bf16.vlgmr.msra.gmra.mxu1 %vm787_vm3, %v1452_v31 }
 0x972   : > { %2536 = vmatprep.mubr.msk.bf16.mxu1 %vm2753_vm2, %v2752_v17  ;;  %2535 = vmatpush3.bf16.msra.mxu1 %v1555_v36 }
 0x973   : > { %2546 = vmatprep.subr.bf16.mxu1 %v2752_v17 }
 0x999   : > { %v1544_v49 = vpop.f32.mrf.mxu0 }
 0x99b   : > { %v2532_v32 = vpop.f32.mrf.mxu0 }
 0x99d   : > { %v1547_v33 = vpop.f32.mrf.mxu0 }
 0x99f   : > { %v2533_v34 = vpop.f32.mrf.mxu0 }
 0xa27   : > { %v1644_v37 = vpop.f32.mrf.mxu0 }
 0xa28   : > { %v1700_v38 = vsel %vm775_vm4, %v1644_v37, -1e+30 }
 0xa29   : > { %v2544_v39 = vpop.f32.mrf.mxu0  ;;  %v1702_v41 = vsel %vm787_vm3, %v1700_v38, -inf }
 0xa2a   : > { %1703 = vmax.xlane.f32.xlu0 %v1702_v41  ;;  %v2362_v39 = vld [vmem:[%s3284_s14] ss:$0 sm:$0xff] }
 0xa2b   : > { %v1647_v42 = vpop.f32.mrf.mxu0 }
 0xa2d   : > { %v2545_v43 = vpop.f32.mrf.mxu0 }
 0xa31   : > { %v1496_v47 = vpop.f32.mrf.mxu1 }
 0xa32   : > { %v1550_v50 = vpack.c.bf16 %v1544_v49, %v1496_v47 }
 0xa33   : > { %v2526_v51 = vpop.f32.mrf.mxu1 }
 0xa34   : > { %2537 = vmatmul.mubr.msk.bf16.vlgmr.msra.gmra.mxu1 %vm787_vm3, %v1550_v50 }
 0xa35   : > { %2547 = vmatpush3.bf16.xpose.msra.mxu1 %v1658_v53  ;;  %v1499_v54 = vpop.f32.mrf.mxu1  ;;  %2548 = vmatprep.mubr.msk.bf16.mxu1 %vm2753_vm2, %v2752_v17 }
 0xa36   : > { %2558 = vmatprep.subr.bf16.mxu1 %v2752_v17 }
 0xa37   : > { %v2527_v55 = vpop.f32.mrf.mxu1 }
 0xa3c   : > { %2549 = vmatmul.mubr.msk.bf16.vlgmr.msra.gmra.mxu1 %vm787_vm3, %v1651_v56 }
 0xa3d   : > { %2560 = vmatprep.mubr.msk.bf16.mxu1 %vm2753_vm2, %v2752_v17 }
 0xab3   : > { %v1704_v57 = vpop.xlane.xlu0 %1703 }
 0xab4   : > { %v1708_v59 = vsub.f32 %v1700_v38, %v1704_v57 }
 0xab6   : > { %v1710_v60 = vmul.f32 1.442695, %v1708_v59 }
 0xab8   : > { %2684 = vpow2.f32 %v1710_v60 }
 0xac5   : > { %v2685_v61 = vpop.eup %2684 }
 0xac6   : > { %v1714_v62 = vsel %vm787_vm3, %v2685_v61, 0.0 }
 0xac7   : > { %1715 = vadd.xlane.f32.xlu0 %v1714_v62 }
 0xaf4   : > { %v1591_v1 = vpop.f32.mrf.mxu1 }
 0xaf5   : > { %v1598_v5 = vadd.f32 %v1591_v1, %v1322_v63 }
 0xaf6   : > { %v2538_v6 = vpop.f32.mrf.mxu1 }
 0xaf7   : > { %v2647_v6 = vld [vmem:[%s2901_s3] sm:$0xff]  }
 0xaf8   : > { %v1594_v7 = vpop.f32.mrf.mxu1 }
 0xaf9   : > { %v3138_v8 = vadd.f32 %v1594_v7, %v1325_v52 }
 0xafa   : > { %v2539_v9 = vpop.f32.mrf.mxu1 }
 0xafc   : > { %v1694_v10 = vpop.f32.mrf.mxu1 }
 0xafd   : > { %v1701_v11 = vsel %vm775_vm4, %v1694_v10, -1e+30 }
 0xafe   : > { %v2550_v12 = vpop.f32.mrf.mxu1  ;;  %v1705_v13 = vsel %vm787_vm3, %v1701_v11, -inf }
 0xaff   : > { %1706 = vmax.xlane.f32.xlu1 %v1705_v13 }
 0xb00   : > { %v1697_v14 = vpop.f32.mrf.mxu1 }
 0xb01   : > { %v2363_v14 = vld [vmem:[%s618_s27] ss:$0 sm:$0xff] }
 0xb02   : > { %v2551_v45 = vpop.f32.mrf.mxu1 }
 0xb10   : > { %1774 = vrot.lane.b32.xlu1 %v2967_v44, %s2764_s22 }
 0xb50   : > { %v1716_v19 = vpop.xlane.xlu0 %1715 }
 0xb88   : > { %v1707_v0 = vpop.xlane.xlu1 %1706 }
 0xb89   : > { %v1709_v15 = vsub.f32 %v1701_v11, %v1707_v0 }
 0xb8b   : > { %v1712_v48 = vmul.f32 1.442695, %v1709_v15 }
 0xb8c   : > { %v1775_v4 = vpop.permute.xlu1 %1774 }
 0xb8d   : > { %2686 = vpow2.f32 %v1712_v48  ;;  %v1780_v16 = vsel %vm916_vm5, %v1775_v4, 0  ;;  %v2364_v48 = vld [vmem:[%s621_s23] ss:$0 sm:$0xff] }
 0xb8e   : > { %2559 = vmatpush3.bf16.msra.mxu1 %v1780_v16  ;;  %2688 = vrcp.f32 %v1716_v19  ;;  %v2648_v19 = vld [vmem:[%s2911_s17 + $0x38] sm:$0xff]  }
 0xb8f   : > { %2570 = vmatprep.subr.bf16.mxu1 %v2752_v17 }
 0xb9a   : > { %v2687_v58 = vpop.eup %2686 }
 0xb9b   : > { %v1717_v18 = vsel %vm787_vm3, %v2687_v58, 0.0  ;;  %v2689_v20 = vpop.eup %2688 }
 0xb9c   : > { %1718 = vadd.xlane.f32.xlu0 %v1717_v18  ;;  %v1722_v21 = vmul.f32 %v2689_v20, %v2685_v61  ;;  %v2649_v20 = vld [vmem:[%s2911_s17 + $0x30] sm:$0xff]  }
 0xb9e   : > { %v1724_v24 = vpack.c.bf16 %v1722_v21, %v1722_v21  ;;  %v2651_v21 = vld [vmem:[%s2911_s17 + $0x20] sm:$0xff]  }
 0xbb2   : > { %1726 = vrot.lane.b32.xlu0 %v2964_v40, %s2764_s22 }
 0xc25   : > { %v1719_v44 = vpop.xlane.xlu0 %1718 }
 0xc26   : > { %2690 = vrcp.f32 %v1719_v44  ;;  %v2650_v44 = vld [vmem:[%s2911_s17 + $0x28] sm:$0xff]  }
 0xc29   : > { %v1727_v22 = vpop.permute.xlu0 %1726 }
 0xc2a   : > { %v1732_v23 = vsel %vm916_vm5, %v1727_v22, 0  ;;  %v2652_v22 = vld [vmem:[%s2911_s17 + $0x18] sm:$0xff]  }
 0xc2b   : > { %2553 = vmatpush3.bf16.msra.mxu0 %v1732_v23  ;;  %v2653_v23 = vld [vmem:[%s2911_s17 + $0x10] sm:$0xff]  }
 0xc2c   : > { %2564 = vmatprep.subr.bf16.mxu0 %v2752_v17 }
 0xc2e   : > { %2555 = vmatmul.mubr.msk.bf16.vlgmr.msra.gmra.mxu0 %vm787_vm3, %v1724_v24  ;;  %v2654_v24 = vld [vmem:[%s2911_s17 + $0x8] sm:$0xff]  }
 0xc2f   : > { %2566 = vmatprep.mubr.msk.bf16.mxu0 %vm2753_vm2, %v2752_v17  ;;  %2565 = vmatpush3.bf16.msra.mxu0 %v1827_v28 }
 0xc30   : > { %2578 = vmatprep.subr.bf16.mxu0 %v2752_v17 }
 0xc33   : > { %v2691_v40 = vpop.eup %2690 }
 0xc34   : > { %v1723_v25 = vmul.f32 %v2691_v40, %v2687_v58  ;;  %v2655_v40 = vld [vmem:[%s2911_s17] sm:$0xff]  }
 0xc36   : > { %v1725_v26 = vpack.c.bf16 %v1723_v25, %v1723_v25  ;;  %v2365_v25 = vld [vmem:[%s629_s5] ss:$0 sm:$0xff] }
 0xc38   : > { %2561 = vmatmul.mubr.msk.bf16.vlgmr.msra.gmra.mxu1 %vm787_vm3, %v1725_v26 }
 0xc39   : > { %2574 = vmatprep.mubr.msk.bf16.mxu1 %vm2753_vm2, %v2752_v17 }
 0xcee   : > { %v1768_v29 = vpop.f32.mrf.mxu0 }
 0xcf0   : > { %v2556_v30 = vpop.f32.mrf.mxu0 }
 0xcf2   : > { %v1771_v31 = vpop.f32.mrf.mxu0 }
 0xcf4   : > { %v2557_v49 = vpop.f32.mrf.mxu0 }
 0xcf8   : > { %v1816_v32 = vpop.f32.mrf.mxu1 }
 0xcf9   : > { %v1822_v33 = vpack.c.bf16 %v1816_v32, %v1768_v29 }
 0xcfa   : > { %v2562_v34 = vpop.f32.mrf.mxu1 }
 0xcfb   : > { %2567 = vmatmul.mubr.msk.bf16.vlgmr.msra.gmra.mxu0 %vm787_vm3, %v1822_v33 }
 0xcfc   : > { %v1819_v35 = vpop.f32.mrf.mxu1  ;;  %2594 = vmatprep.mubr.msk.bf16.mxu0 %vm2753_vm2, %v2752_v17  ;;  %2579 = vmatpush3.bf16.msra.mxu0 %v2648_v19 }
 0xcfd   : > { %2580 = vmatprep.subr.bf16.mxu0 %v2752_v17 }
 0xcfe   : > { %v2563_v36 = vpop.f32.mrf.mxu1 }
 0xd00   : > { %2581 = vmatpush3.bf16.msra.mxu0 %v2649_v20 }
 0xd01   : > { %2582 = vmatprep.subr.bf16.mxu0 %v2752_v17 }
 0xd04   : > { %2583 = vmatpush3.bf16.msra.mxu0 %v2650_v44 }
 0xd05   : > { %2584 = vmatprep.subr.bf16.mxu0 %v2752_v17 }
 0xd08   : > { %2585 = vmatpush3.bf16.msra.mxu0 %v2651_v21 }
 0xd09   : > { %2586 = vmatprep.subr.bf16.mxu0 %v2752_v17 }
 0xd0c   : > { %2587 = vmatpush3.bf16.msra.mxu0 %v2652_v22 }
 0xd0d   : > { %2588 = vmatprep.subr.bf16.mxu0 %v2752_v17 }
 0xd10   : > { %2589 = vmatpush3.bf16.msra.mxu0 %v2653_v23 }
 0xd11   : > { %2590 = vmatprep.subr.bf16.mxu0 %v2752_v17 }
 0xd14   : > { %2591 = vmatpush3.bf16.msra.mxu0 %v2654_v24 }
 0xd15   : > { %2592 = vmatprep.subr.bf16.mxu0 %v2752_v17 }
 0xd18   : > { %2593 = vmatpush3.bf16.msra.mxu0 %v2655_v40 }
 0xdbb   : > { %v1863_v37 = vpop.f32.mrf.mxu0 }
 0xdbc   : > { %v1870_v38 = vadd.f32 %v1863_v37, %v1598_v5  ;;  %v2646_v5 = vld [vmem:[%s2901_s3 + $0x8] sm:$0xff]  }
 0xdbd   : > { %v2568_v41 = vpop.f32.mrf.mxu0  ;;  %2571 = vmatpush3.bf16.msra.mxu1 %v2646_v5 }
 0xdbe   : > { %v1872_v42 = vadd.f32 %v1870_v38, %v2924_v2  ;;  %2572 = vmatprep.subr.bf16.mxu1 %v2752_v17 }
 0xdbf   : > { %v1866_v43 = vpop.f32.mrf.mxu0 }
 0xdc0   : > { %v3168_v46 = vadd.f32 %v2362_v39, %v1872_v42  ;;  %v1871_v47 = vadd.f32 %v1866_v43, %v3138_v8 }
 0xdc1   : > { %v2569_v50 = vpop.f32.mrf.mxu0  ;;  %2573 = vmatpush3.bf16.msra.mxu1 %v2647_v6 }
 0xdc2   : > { %v1873_v51 = vadd.f32 %v1871_v47, %v2926_v3  ;;  %v1885_v53 = vsel %vm653_vm1, %v3168_v46, 0.0 }
 0xdc3   : > { %1886 = vadd.xlane.f32.xlu1 %v1885_v53 }
 0xdc4   : > { %v3174_v54 = vadd.f32 %v2362_v39, %v1873_v51 }
 0xdc6   : > { %v1888_v55 = vsel %vm653_vm1, %v3174_v54, 0.0 }
 0xdc7   : > { %1889 = vadd.xlane.f32.xlu0 %v1888_v55 }
 0xe4c   : > { %v1887_v2 = vpop.xlane.xlu1 %1886 }
 0xe4d   : > { %v1891_v56 = vmul.f32 0.03125, %v1887_v2 }
 0xe4f   : > { %v1893_v57 = vsub.f32 %v3168_v46, %v1891_v56  ;;  %v2369_v56 = vld [vmem:[%s637_s21] ss:$0 sm:$0xff] }
 0xe50   : > { %v1890_v59 = vpop.xlane.xlu0 %1889 }
 0xe51   : > { %v1892_v60 = vmul.f32 0.03125, %v1890_v59  ;;  %v1895_v61 = vmul.f32 %v1893_v57, %v1893_v57 }
 0xe53   : > { %v1894_v3 = vsub.f32 %v3174_v54, %v1892_v60  ;;  %v1897_v62 = vsel %vm653_vm1, %v1895_v61, 0.0 }
 0xe54   : > { %1898 = vadd.xlane.f32.xlu0 %v1897_v62 }
 0xe55   : > { %v1896_v63 = vmul.f32 %v1894_v3, %v1894_v3 }
 0xe57   : > { %v1900_v1 = vsel %vm653_vm1, %v1896_v63, 0.0 }
 0xe58   : > { %1901 = vadd.xlane.f32.xlu1 %v1900_v1 }
 0xedd   : > { %v1899_v52 = vpop.xlane.xlu0 %1898 }
 0xede   : > { %v1903_v7 = vmul.f32 0.03125, %v1899_v52 }
 0xee0   : > { %v1905_v8 = vadd.f32 1e-05, %v1903_v7 }
 0xee1   : > { %v1902_v9 = vpop.xlane.xlu1 %1901 }
 0xee2   : > { %2692 = vrsqrt.f32 %v1905_v8  ;;  %v1904_v10 = vmul.f32 0.03125, %v1902_v9 }
 0xee4   : > { %v1906_v11 = vadd.f32 1e-05, %v1904_v10 }
 0xee6   : > { %2694 = vrsqrt.f32 %v1906_v11 }
 0xeef   : > { %v2693_v12 = vpop.eup %2692 }
 0xef0   : > { %v1909_v13 = vmul.f32 %v2693_v12, %v1893_v57 }
 0xef2   : > { %v1917_v15 = vmul.f32 %v2363_v14, %v1909_v13 }
 0xef3   : > { %v2695_v45 = vpop.eup %2694 }
 0xef4   : > { %v1910_v0 = vmul.f32 %v2695_v45, %v1894_v3  ;;  %v1925_v16 = vadd.f32 %v2364_v48, %v1917_v15 }
 0xef6   : > { %v1918_v4 = vmul.f32 %v2363_v14, %v1910_v0 }
 0xef8   : > { %v1926_v58 = vadd.f32 %v2364_v48, %v1918_v4 }
 0xefa   : > { %v1927_v18 = vpack.c.bf16 %v1926_v58, %v1925_v16 }
 0xefc   : > { %2575 = vmatmul.mubr.msk.bf16.vlgmr.msra.gmra.mxu1 %vm653_vm1, %v1927_v18 }
 0xfbc   : > { %v1988_v26 = vpop.f32.mrf.mxu1 }
 0xfbd   : > { %v1989_v27 = vadd.f32 %v2365_v25, %v1988_v26 }
 0xfbe   : > { %v2576_v28 = vpop.f32.mrf.mxu1 }
 0xfbf   : > { %v1995_v29 = vmul.f32 %v1989_v27, %v1989_v27 }
 0xfc0   : > { %v1991_v30 = vpop.f32.mrf.mxu1 }
 0xfc1   : > { %v1997_v31 = vmul.f32 %v1995_v29, %v1989_v27  ;;  %v1992_v49 = vadd.f32 %v2365_v25, %v1991_v30 }
 0xfc2   : > { %v2577_v32 = vpop.f32.mrf.mxu1 }
 0xfc3   : > { %v1999_v33 = vmul.f32 0.044715, %v1997_v31  ;;  %v1996_v34 = vmul.f32 %v1992_v49, %v1992_v49 }
 0xfc5   : > { %v2001_v35 = vadd.f32 %v1999_v33, %v1989_v27  ;;  %v1998_v36 = vmul.f32 %v1996_v34, %v1992_v49 }
 0xfc7   : > { %v2003_v17 = vmul.f32 0.7978846, %v2001_v35  ;;  %v2000_v37 = vmul.f32 0.044715, %v1998_v36 }
 0xfc9   : > { %2696 = vtanh.f32 %v2003_v17  ;;  %v2002_v38 = vadd.f32 %v2000_v37, %v1992_v49 }
 0xfcb   : > { %v2004_v39 = vmul.f32 0.7978846, %v2002_v38 }
 0xfcd   : > { %2698 = vtanh.f32 %v2004_v39 }
 0xfd6   : > { %v2697_v41 = vpop.eup %2696 }
 0xfd7   : > { %v2007_v42 = vadd.f32 1.0, %v2697_v41 }
 0xfd9   : > { %v2009_v47 = vmul.f32 0.5, %v2007_v42 }
 0xfda   : > { %v2699_v43 = vpop.eup %2698 }
 0xfdb   : > { %v2008_v50 = vadd.f32 1.0, %v2699_v43  ;;  %v2011_v53 = vmul.f32 %v2009_v47, %v1989_v27 }
 0xfdd   : > { %v2010_v51 = vmul.f32 0.5, %v2008_v50 }
 0xfdf   : > { %v2012_v55 = vmul.f32 %v2010_v51, %v1992_v49 }
 0xfe1   : > { %v2013_v2 = vpack.c.bf16 %v2012_v55, %v2011_v53 }
 0xfe3   : > { %2595 = vmatmul.mubr.bf16.vlgmr.msra.gmra.mxu0 %v2013_v2 }
0x10a3   : > { %v2119_v57 = vpop.f32.mrf.mxu0 }
0x10a4   : > { %v2120_v59 = vadd.f32 %v2369_v56, %v2119_v57 }
0x10a5   : > { %v2596_v60 = vpop.f32.mrf.mxu0 }
0x10a6   : > { %v2126_v61 = vadd.f32 %v2120_v59, %v3168_v46 }
0x10a7   : > { %v2122_v3 = vpop.f32.mrf.mxu0 }
0x10a8   : > { %2128 = vst.msk [vmem:[#allocation2] sm:$0xff] %vm653_vm1, %v2126_v61  ;;  %v2123_v62 = vadd.f32 %v2369_v56, %v2122_v3  ;;  %2133 = sbr.rel (%p2378_p6) target bundleno = 4270 (0x10ae), region = 80 }
0x10a9   : > { %v2597_v63 = vpop.f32.mrf.mxu0 }
0x10aa   : > { %v2127_v1 = vadd.f32 %v2123_v62, %v3174_v54 }
0x10ac   : > { %2129 = vst.msk [vmem:[#allocation2 + $0x8] sm:$0xff] %vm653_vm1, %v2127_v1 }
0x10ad   : > { %2134 = vst.msk [vmem:[#allocation3] sm:$0xff] %vm653_vm1, %v2126_v61  ;;  %2135 = vst.msk [vmem:[#allocation3 + $0x8] sm:$0xff] %vm653_vm1, %v2127_v1 }
0x10ae PF: > { %s3285_s30 = sld [smem:[#allocation7_spill]]  ;;  %s2765_s13 = smov [#allocation3]  }
0x10af   : > { %s2145_s16 = sshll.u32 %s2765_s13, 4  ;;  %s2146_s16 = int_to_ptr.vmem [resolvable:$true] %s2145_s16 }
0x10b0   : > { %s2700_s19 = scalar_lea.vmem %s2146_s16, 256  ;;  %p2707_p11 = scmp.lt.s32.totalorder %s2146_s16, %s2146_s16 }
0x10b1   : > { %p2701_p8 = scmp.ne.s32.totalorder %s2146_s16, %s2700_s19  ;;  %p2708_p12 = scmp.lt.s32.totalorder %s2700_s19, %s2700_s19 }
0x10b3   : > { %p2709_p13 = por %p2708_p12, %p2707_p11 }
0x10b4   : > { %s3286_s21 = sadd.s32 4294967295, %s3285_s30  }
0x10b5   : > { %p3230_p7 = scmp.eq.s32.totalorder %s3286_s21, 1 }
0x10b7   : > { %p2702_p9 = pnand %p2701_p8, %p3230_p7 }
0x10b9   : > { %p2703_p10 = pneg %p2702_p9 }
0x10bb   : > { %p2710_p0 = pnand %p2709_p13, %p2703_p10 }
0x10bd   : > { %2713 = shalt.err (!%p2710_p0)
}
0x10be   : > { %s2766_s25 = smov 128   ;;  %s2767_s18 = smov 8  }
0x10bf   : > { %s3288_s24 = sld [smem:[#allocation12_spill]] }
0x10c5   : > { %2599 = dma.vmem_to_hbm [thread:$0]  (%p3230_p7), %s2146_s16, 256, %s3288_s24, [#allocation4], %s2766_s25, %s2766_s25, %s2767_s18  }
0x10c6   : > { %2737 = dma.done.wait (%p3230_p7), [#allocation4], 256  }
0x10c7   : > { %2739 = vsyncadd (%p3230_p7), [#allocation4], 4294967040 }
0x10c8 PF: > { %s3289_s14 = sld [smem:[#allocation7_spill]] }
0x10c9   : > { %s3290_s25 = sld [smem:[#allocation6_spill]] }
0x10ca   : > { %s3291_s26 = sld [smem:[#allocation8_spill]] }
0x10ce   : > { %s24_s27 = sadd.s32 1, %s3289_s14  }
0x10cf   : > { %p21_p1 = scmp.ge.s32.totalorder %s24_s27, 4  }
0x10d1   :  { %23 = sbr.rel (!%p21_p1) target bundleno = 6 (0x6), region = 144 }
0x10d6   :  { %2161 = vsyncpa [#allocation4], 1 }
0x10d7   :  { %2163 = vsyncpa [#allocation4 + $0x1], 1 }

</bundles_post_ra>
